<compile_context>
chip_gen: v5e
topology: v5e:2x2
jax: 0.10.0
libtpu: 0.0.40
codegen_flags: <defaults>
</compile_context>

<pallas_src>
import jax
import jax.numpy as jnp
import numpy as np
from jax.experimental import pallas as pl
from jax.experimental.pallas import tpu as pltpu

# ---------------- problem sizes (small, consistent with the module) ----------
B = 2           # batch
N = 8           # sequence length
DIM = 32        # channel dim (reduction = 1)
HEADS = 8       # num_heads
HD = DIM // HEADS
SCALE = HD ** (-0.5)
LN_EPS = 1e-5
NEG_INF = -1e30


# ------------------------------ Pallas kernel --------------------------------
def crosspath_kernel(x_ref, wproj_ref, wkv_ref, wend_ref, vec_ref, mask_ref, o_ref):
    C = DIM
    X = x_ref[...]                                  # (B*N, 3C) = [x1 | x2 | seg]

    b_proj = vec_ref[:, 0:7 * C]                    # (1, 7C)
    b_end = vec_ref[:, 7 * C:9 * C]                 # (1, 2C)
    g1 = vec_ref[:, 9 * C:10 * C]
    bt1 = vec_ref[:, 10 * C:11 * C]
    g2 = vec_ref[:, 11 * C:12 * C]
    bt2 = vec_ref[:, 12 * C:13 * C]

    # Fused channel_proj{1,2,3} + ReLU (one block-diagonal MXU matmul).
    # P columns: [y3 | y3 | u1 | u2 | y1 | y2 | u3]  (7C = 224 lanes)
    P = jnp.maximum(
        jnp.dot(X, wproj_ref[...], preferred_element_type=jnp.float32) + b_proj, 0.0)

    Q = P[:, 0:4 * C]                               # (B*N, 128) = [y3 | y3 | u1 | u2]

    # Fused kv1(y1) | kv2(y2) | kv3(u3) (attention scale folded into K columns).
    # KV columns: [k1 | k2 | k3 | k3 | v1 | v2 | v3 | v3]  (8C = 256 lanes)
    KV = jnp.dot(P[:, 4 * C:7 * C], wkv_ref[...], preferred_element_type=jnp.float32)
    K = KV[:, 0:4 * C]                              # (B*N, 128)
    V = KV[:, 4 * C:8 * C]                          # (B*N, 128)

    Kt = K.T                                        # single XLU transpose, shared by both batches
    mask = mask_ref[...]                            # (128,128) additive: 0 on 4-wide head blocks, -1e30 off
    wend = wend_ref[...]                            # (4C, 2C) block-diag end-proj weights

    def layer_norm(x, g, bt):
        mu = jnp.mean(x, axis=-1, keepdims=True)
        var = jnp.mean((x - mu) ** 2, axis=-1, keepdims=True)
        return (x - mu) * jax.lax.rsqrt(var + LN_EPS) * g + bt

    for b in range(B):                              # B = 2, static unroll
        rb = slice(b * N, (b + 1) * N)
        # S diag 32-blocks = [k1^Tv1 | k2^Tv2 | k3^Tv3 | k3^Tv3] (scale pre-folded).
        S = jnp.dot(Kt[:, rb], V[rb], preferred_element_type=jnp.float32) + mask
        S = S - jnp.max(S, axis=0, keepdims=True)   # softmax over dim=-2 (columns)
        Ez = jnp.exp(S)
        ctx = Ez * pl.reciprocal(jnp.sum(Ez, axis=0, keepdims=True))   # exact reciprocal

        # Apply: ZV columns = [z1 | z2 | v1 | v2]  (already in end-proj row order)
        ZV = jnp.dot(Q[rb], ctx, preferred_element_type=jnp.float32)   # (N, 128)

        # Fused end_proj1 | end_proj2 + biases, residual, LayerNorm.
        Eo = jnp.dot(ZV, wend, preferred_element_type=jnp.float32) + b_end   # (N, 2C)
        r1 = X[rb, 0:C] + Eo[:, 0:C]
        r2 = X[rb, C:2 * C] + Eo[:, C:2 * C]

        # Lane-dense (8,128) output slab: [o1_b0 | o2_b0 | o1_b1 | o2_b1]
        o_ref[:, (2 * b) * C:(2 * b + 1) * C] = layer_norm(r1, g1, bt1)
        o_ref[:, (2 * b + 1) * C:(2 * b + 2) * C] = layer_norm(r2, g2, bt2)


# ------------------------------ one-time parameter packing -------------------
def pack_params(p):
    """Pack the 17 parameter tensors into 5 slabs. Call ONCE and reuse (hoisted
    out of the per-forward path)."""
    C = DIM
    assert DIM % HEADS == 0 and HD * HEADS == DIM
    # Every softmax column has exactly HD valid rows -> additive mask cannot
    # produce a fully-masked (NaN) column.
    assert HD >= 1

    w1, w2, w3 = p["w1"], p["w2"], p["w3"]
    # X row blocks: [x1 | x2 | seg]; P columns: [y3 | y3 | u1 | u2 | y1 | y2 | u3]
    W_proj = jnp.zeros((3 * C, 7 * C), jnp.float32)
    W_proj = W_proj.at[2 * C:3 * C, 0 * C:1 * C].set(w3[:, :C])   # y3
    W_proj = W_proj.at[2 * C:3 * C, 1 * C:2 * C].set(w3[:, :C])   # y3 (dup)
    W_proj = W_proj.at[0:C, 2 * C:3 * C].set(w1[:, C:])           # u1
    W_proj = W_proj.at[C:2 * C, 3 * C:4 * C].set(w2[:, C:])       # u2
    W_proj = W_proj.at[0:C, 4 * C:5 * C].set(w1[:, :C])           # y1
    W_proj = W_proj.at[C:2 * C, 5 * C:6 * C].set(w2[:, :C])       # y2
    W_proj = W_proj.at[2 * C:3 * C, 6 * C:7 * C].set(w3[:, C:])   # u3
    b_proj = jnp.concatenate([p["b3"][:C], p["b3"][:C], p["b1"][C:], p["b2"][C:],
                              p["b1"][:C], p["b2"][:C], p["b3"][C:]])

    wk1, wk2, wk3 = p["wkv1"], p["wkv2"], p["wkv3"]
    # Input rows: [y1 | y2 | u3]; columns: [k1 | k2 | k3 | k3 | v1 | v2 | v3 | v3]
    # Attention scale folded into the K columns (one-time, saves an in-kernel mul).
    W_kv = jnp.zeros((3 * C, 8 * C), jnp.float32)
    W_kv = W_kv.at[0:C, 0 * C:1 * C].set(wk1[:, :C] * SCALE)
    W_kv = W_kv.at[C:2 * C, 1 * C:2 * C].set(wk2[:, :C] * SCALE)
    W_kv = W_kv.at[2 * C:3 * C, 2 * C:3 * C].set(wk3[:, :C] * SCALE)
    W_kv = W_kv.at[2 * C:3 * C, 3 * C:4 * C].set(wk3[:, :C] * SCALE)
    W_kv = W_kv.at[0:C, 4 * C:5 * C].set(wk1[:, C:])
    W_kv = W_kv.at[C:2 * C, 5 * C:6 * C].set(wk2[:, C:])
    W_kv = W_kv.at[2 * C:3 * C, 6 * C:7 * C].set(wk3[:, C:])
    W_kv = W_kv.at[2 * C:3 * C, 7 * C:8 * C].set(wk3[:, C:])

    # ZV row order [z1 | z2 | v1 | v2]; columns [e1 | e2]
    W_end = jnp.zeros((4 * C, 2 * C), jnp.float32)
    W_end = W_end.at[0:C, 0:C].set(p["we1"][0:C, :])
    W_end = W_end.at[C:2 * C, C:2 * C].set(p["we2"][0:C, :])
    W_end = W_end.at[2 * C:3 * C, 0:C].set(p["we1"][C:2 * C, :])
    W_end = W_end.at[3 * C:4 * C, C:2 * C].set(p["we2"][C:2 * C, :])
    b_end = jnp.concatenate([p["be1"], p["be2"]])

    vec = jnp.concatenate(
        [b_proj, b_end, p["g1"], p["bt1"], p["g2"], p["bt2"]]).reshape(1, 13 * C)

    # Additive head mask: 0 on the 4-wide block diagonal, -1e30 elsewhere.
    idx = np.arange(4 * C)
    mask = np.where((idx[:, None] // HD) == (idx[None, :] // HD),
                    np.float32(0.0), np.float32(NEG_INF)).astype(np.float32)
    return W_proj, W_kv, W_end, vec, jnp.asarray(mask)


# ------------------------------ wrapper ---------------------------------------
def crosspath_pallas(x1, x2, seg, W_proj, W_kv, W_end, vec, mask):
    Bz, Nz, C = x1.shape
    assert (Bz, Nz, C) == (B, N, DIM)
    # Single input slab: rows = batch*N, lanes = [x1 | x2 | seg]
    X = jnp.concatenate([x1, x2, seg], axis=-1).reshape(Bz * Nz, 3 * C)

    vmem = pl.BlockSpec(memory_space=pltpu.MemorySpace.VMEM)
    out = pl.pallas_call(
        crosspath_kernel,
        in_specs=[vmem] * 6,
        out_specs=vmem,
        out_shape=jax.ShapeDtypeStruct((Nz, 2 * Bz * C), jnp.float32),
    )(X, W_proj, W_kv, W_end, vec, mask)

    # out columns: b * 2C + stream * C + c
    out4 = out.reshape(Nz, Bz, 2, C)
    o1 = jnp.transpose(out4[:, :, 0, :], (1, 0, 2))
    o2 = jnp.transpose(out4[:, :, 1, :], (1, 0, 2))
    return o1, o2


crosspath_pallas_jit = jax.jit(crosspath_pallas)


# ------------------------------ pure-JAX reference ----------------------------
def crosspath_reference(x1, x2, seg, p):
    C = x1.shape[-1]
    Bz, Nz, _ = x1.shape

    def lin(x, w, bias=None):
        y = x @ w
        return y + bias if bias is not None else y

    p1 = jax.nn.relu(lin(x1, p["w1"], p["b1"]))
    p2 = jax.nn.relu(lin(x2, p["w2"], p["b2"]))
    p3 = jax.nn.relu(lin(seg, p["w3"], p["b3"]))
    y1, u1 = p1[..., :C], p1[..., C:]
    y2, u2 = p2[..., :C], p2[..., C:]
    y3, u3 = p3[..., :C], p3[..., C:]

    def heads(t):
        return t.reshape(Bz, Nz, HEADS, HD).transpose(0, 2, 1, 3)

    def kv_split(t):
        t = t.reshape(Bz, Nz, 2, HEADS, HD).transpose(2, 0, 3, 1, 4)
        return t[0], t[1]

    def ctx_of(k, v):
        c = jnp.einsum("bhnd,bhne->bhde", k, v) * SCALE
        return jax.nn.softmax(c, axis=-2)

    def apply(q, c):
        return jnp.einsum("bhnd,bhde->bhne", q, c).transpose(0, 2, 1, 3).reshape(Bz, Nz, C)

    # CrossAttention(u1, u2, u3)
    k3, v3 = kv_split(lin(u3, p["wkv3"]))
    ctx3 = ctx_of(k3, v3)
    v1o = apply(heads(u1), ctx3)
    v2o = apply(heads(u2), ctx3)
    # CrossAttention2(y1, y2, y3)
    k1, v1 = kv_split(lin(y1, p["wkv1"]))
    k2, v2 = kv_split(lin(y2, p["wkv2"]))
    z1 = apply(heads(y3), ctx_of(k1, v1))
    z2 = apply(heads(y3), ctx_of(k2, v2))

    def ln(x, g, b):
        mu = x.mean(-1, keepdims=True)
        var = ((x - mu) ** 2).mean(-1, keepdims=True)
        return (x - mu) / jnp.sqrt(var + LN_EPS) * g + b

    o1 = ln(x1 + lin(jnp.concatenate([z1, v1o], -1), p["we1"], p["be1"]),
            p["g1"], p["bt1"])
    o2 = ln(x2 + lin(jnp.concatenate([z2, v2o], -1), p["we2"], p["be2"]),
            p["g2"], p["bt2"])
    return o1, o2


# ------------------------------ main -------------------------------------------
if __name__ == "__main__":
    key = jax.random.PRNGKey(0)
    keys = jax.random.split(key, 24)

    x1 = jax.random.normal(keys[0], (B, N, DIM), jnp.float32)
    x2 = jax.random.normal(keys[1], (B, N, DIM), jnp.float32)
    seg = jax.random.normal(keys[2], (B, N, DIM), jnp.float32)

    # Deterministic synthetic parameters (weights stored as (in, out), i.e. W^T).
    s = 0.1
    params = {
        "w1": s * jax.random.normal(keys[3], (DIM, 2 * DIM), jnp.float32),
        "b1": s * jax.random.normal(keys[4], (2 * DIM,), jnp.float32),
        "w2": s * jax.random.normal(keys[5], (DIM, 2 * DIM), jnp.float32),
        "b2": s * jax.random.normal(keys[6], (2 * DIM,), jnp.float32),
        "w3": s * jax.random.normal(keys[7], (DIM, 2 * DIM), jnp.float32),
        "b3": s * jax.random.normal(keys[8], (2 * DIM,), jnp.float32),
        "wkv1": s * jax.random.normal(keys[9], (DIM, 2 * DIM), jnp.float32),
        "wkv2": s * jax.random.normal(keys[10], (DIM, 2 * DIM), jnp.float32),
        "wkv3": s * jax.random.normal(keys[11], (DIM, 2 * DIM), jnp.float32),
        "we1": s * jax.random.normal(keys[12], (2 * DIM, DIM), jnp.float32),
        "be1": s * jax.random.normal(keys[13], (DIM,), jnp.float32),
        "we2": s * jax.random.normal(keys[14], (2 * DIM, DIM), jnp.float32),
        "be2": s * jax.random.normal(keys[15], (DIM,), jnp.float32),
        "g1": 1.0 + s * jax.random.normal(keys[16], (DIM,), jnp.float32),
        "bt1": s * jax.random.normal(keys[17], (DIM,), jnp.float32),
        "g2": 1.0 + s * jax.random.normal(keys[18], (DIM,), jnp.float32),
        "bt2": s * jax.random.normal(keys[19], (DIM,), jnp.float32),
    }

    # Pack once (hoisted out of the per-forward path); reuse for every call.
    W_proj, W_kv, W_end, vec, mask = jax.block_until_ready(pack_params(params))

    out1, out2 = crosspath_pallas_jit(x1, x2, seg, W_proj, W_kv, W_end, vec, mask)
    jax.block_until_ready((out1, out2))

    ref1, ref2 = crosspath_reference(x1, x2, seg, params)
    # Tolerance accounts for MXU accumulation-order / default-precision differences
    # between the in-kernel f32 matmuls and the XLA reference.
    np.testing.assert_allclose(np.asarray(out1), np.asarray(ref1), rtol=2e-3, atol=2e-3)
    np.testing.assert_allclose(np.asarray(out2), np.asarray(ref2), rtol=2e-3, atol=2e-3)

    print("KERNEL_OK")
</pallas_src>

<mosaic_0001>
module attributes {stable_mosaic.version = 11 : i64} {
  func.func @crosspath_kernel(%arg0: memref<16x96xf32, #tpu.memory_space<vmem>>, %arg1: memref<96x224xf32, #tpu.memory_space<vmem>>, %arg2: memref<96x256xf32, #tpu.memory_space<vmem>>, %arg3: memref<128x64xf32, #tpu.memory_space<vmem>>, %arg4: memref<1x416xf32, #tpu.memory_space<vmem>>, %arg5: memref<128x128xf32, #tpu.memory_space<vmem>>, %arg6: memref<8x128xf32, #tpu.memory_space<vmem>>) attributes {dimension_semantics = [], scalar_prefetch = 0 : i64, scratch_operands = 0 : i64, tpu.core_type = #tpu.core_type<tc>} {
    %c0 = arith.constant 0 : index
    %c0_0 = arith.constant 0 : index
    %0 = vector.load %arg0[%c0, %c0_0] : memref<16x96xf32, #tpu.memory_space<vmem>>, vector<16x96xf32>
    %c0_1 = arith.constant 0 : index
    %c0_2 = arith.constant 0 : index
    %1 = vector.load %arg4[%c0_1, %c0_2] : memref<1x416xf32, #tpu.memory_space<vmem>>, vector<1x224xf32>
    %c0_3 = arith.constant 0 : index
    %c224 = arith.constant 224 : index
    %2 = vector.load %arg4[%c0_3, %c224] : memref<1x416xf32, #tpu.memory_space<vmem>>, vector<1x64xf32>
    %c0_4 = arith.constant 0 : index
    %c288 = arith.constant 288 : index
    %3 = vector.load %arg4[%c0_4, %c288] : memref<1x416xf32, #tpu.memory_space<vmem>>, vector<1x32xf32>
    %c0_5 = arith.constant 0 : index
    %c320 = arith.constant 320 : index
    %4 = vector.load %arg4[%c0_5, %c320] : memref<1x416xf32, #tpu.memory_space<vmem>>, vector<1x32xf32>
    %c0_6 = arith.constant 0 : index
    %c352 = arith.constant 352 : index
    %5 = vector.load %arg4[%c0_6, %c352] : memref<1x416xf32, #tpu.memory_space<vmem>>, vector<1x32xf32>
    %c0_7 = arith.constant 0 : index
    %c384 = arith.constant 384 : index
    %6 = vector.load %arg4[%c0_7, %c384] : memref<1x416xf32, #tpu.memory_space<vmem>>, vector<1x32xf32>
    %c0_8 = arith.constant 0 : index
    %c0_9 = arith.constant 0 : index
    %7 = vector.load %arg1[%c0_8, %c0_9] : memref<96x224xf32, #tpu.memory_space<vmem>>, vector<96x224xf32>
    %cst = arith.constant dense<0.000000e+00> : vector<16x224xf32>
    %8 = tpu.matmul %0, %7, %cst {dimension_numbers = #tpu.dot_dimension_numbers<[1], [0], [0], [1], [0, 0, 1, 1], [], []>} : vector<16x96xf32>, vector<96x224xf32>, vector<16x224xf32> -> vector<16x224xf32>
    %9 = vector.broadcast %1 : vector<1x224xf32> to vector<16x224xf32>
    %10 = arith.addf %8, %9 : vector<16x224xf32>
    %cst_10 = arith.constant 0.000000e+00 : f32
    %11 = vector.broadcast %cst_10 : f32 to vector<16x224xf32>
    %12 = arith.maximumf %10, %11 : vector<16x224xf32>
    %13 = vector.extract_strided_slice %12 {offsets = [0, 0], sizes = [16, 128], strides = [1, 1]} : vector<16x224xf32> to vector<16x128xf32>
    %14 = vector.extract_strided_slice %12 {offsets = [0, 128], sizes = [16, 96], strides = [1, 1]} : vector<16x224xf32> to vector<16x96xf32>
    %c0_11 = arith.constant 0 : index
    %c0_12 = arith.constant 0 : index
    %15 = vector.load %arg2[%c0_11, %c0_12] : memref<96x256xf32, #tpu.memory_space<vmem>>, vector<96x256xf32>
    %cst_13 = arith.constant dense<0.000000e+00> : vector<16x256xf32>
    %16 = tpu.matmul %14, %15, %cst_13 {dimension_numbers = #tpu.dot_dimension_numbers<[1], [0], [0], [1], [0, 0, 1, 1], [], []>} : vector<16x96xf32>, vector<96x256xf32>, vector<16x256xf32> -> vector<16x256xf32>
    %17 = vector.extract_strided_slice %16 {offsets = [0, 0], sizes = [16, 128], strides = [1, 1]} : vector<16x256xf32> to vector<16x128xf32>
    %18 = vector.extract_strided_slice %16 {offsets = [0, 128], sizes = [16, 128], strides = [1, 1]} : vector<16x256xf32> to vector<16x128xf32>
    %19 = tpu.transpose %17, [1, 0] : vector<16x128xf32> -> vector<128x16xf32>
    %c0_14 = arith.constant 0 : index
    %c0_15 = arith.constant 0 : index
    %20 = vector.load %arg5[%c0_14, %c0_15] : memref<128x128xf32, #tpu.memory_space<vmem>>, vector<128x128xf32>
    %c0_16 = arith.constant 0 : index
    %c0_17 = arith.constant 0 : index
    %21 = vector.load %arg3[%c0_16, %c0_17] : memref<128x64xf32, #tpu.memory_space<vmem>>, vector<128x64xf32>
    %22 = vector.extract_strided_slice %19 {offsets = [0, 0], sizes = [128, 8], strides = [1, 1]} : vector<128x16xf32> to vector<128x8xf32>
    %23 = vector.extract_strided_slice %18 {offsets = [0, 0], sizes = [8, 128], strides = [1, 1]} : vector<16x128xf32> to vector<8x128xf32>
    %cst_18 = arith.constant dense<0.000000e+00> : vector<128x128xf32>
    %24 = tpu.matmul %22, %23, %cst_18 {dimension_numbers = #tpu.dot_dimension_numbers<[1], [0], [0], [1], [0, 0, 1, 1], [], []>} : vector<128x8xf32>, vector<8x128xf32>, vector<128x128xf32> -> vector<128x128xf32>
    %25 = arith.addf %24, %20 : vector<128x128xf32>
    %cst_19 = arith.constant dense<0xFF800000> : vector<128xf32>
    %26 = vector.multi_reduction <maximumf>, %25, %cst_19 [0] : vector<128x128xf32> to vector<128xf32>
    %27 = vector.shape_cast %26 : vector<128xf32> to vector<1x128xf32>
    %28 = vector.broadcast %27 : vector<1x128xf32> to vector<128x128xf32>
    %29 = arith.subf %25, %28 : vector<128x128xf32>
    %30 = math.exp %29 : vector<128x128xf32>
    %cst_20 = arith.constant dense<0.000000e+00> : vector<128xf32>
    %31 = vector.multi_reduction <add>, %30, %cst_20 [0] : vector<128x128xf32> to vector<128xf32>
    %32 = vector.shape_cast %31 : vector<128xf32> to vector<1x128xf32>
    %33 = tpu.reciprocal %32 : vector<1x128xf32> -> vector<1x128xf32>
    %34 = vector.broadcast %33 : vector<1x128xf32> to vector<128x128xf32>
    %35 = arith.mulf %30, %34 : vector<128x128xf32>
    %36 = vector.extract_strided_slice %13 {offsets = [0, 0], sizes = [8, 128], strides = [1, 1]} : vector<16x128xf32> to vector<8x128xf32>
    %cst_21 = arith.constant dense<0.000000e+00> : vector<8x128xf32>
    %37 = tpu.matmul %36, %35, %cst_21 {dimension_numbers = #tpu.dot_dimension_numbers<[1], [0], [0], [1], [0, 0, 1, 1], [], []>} : vector<8x128xf32>, vector<128x128xf32>, vector<8x128xf32> -> vector<8x128xf32>
    %cst_22 = arith.constant dense<0.000000e+00> : vector<8x64xf32>
    %38 = tpu.matmul %37, %21, %cst_22 {dimension_numbers = #tpu.dot_dimension_numbers<[1], [0], [0], [1], [0, 0, 1, 1], [], []>} : vector<8x128xf32>, vector<128x64xf32>, vector<8x64xf32> -> vector<8x64xf32>
    %39 = vector.broadcast %2 : vector<1x64xf32> to vector<8x64xf32>
    %40 = arith.addf %38, %39 : vector<8x64xf32>
    %41 = vector.extract_strided_slice %0 {offsets = [0, 0], sizes = [8, 32], strides = [1, 1]} : vector<16x96xf32> to vector<8x32xf32>
    %42 = vector.extract_strided_slice %40 {offsets = [0, 0], sizes = [8, 32], strides = [1, 1]} : vector<8x64xf32> to vector<8x32xf32>
    %43 = arith.addf %41, %42 : vector<8x32xf32>
    %44 = vector.extract_strided_slice %0 {offsets = [0, 32], sizes = [8, 32], strides = [1, 1]} : vector<16x96xf32> to vector<8x32xf32>
    %45 = vector.extract_strided_slice %40 {offsets = [0, 32], sizes = [8, 32], strides = [1, 1]} : vector<8x64xf32> to vector<8x32xf32>
    %46 = arith.addf %44, %45 : vector<8x32xf32>
    %cst_23 = arith.constant dense<0.000000e+00> : vector<8xf32>
    %47 = vector.multi_reduction <add>, %43, %cst_23 [1] : vector<8x32xf32> to vector<8xf32>
    %48 = vector.shape_cast %47 : vector<8xf32> to vector<8x1xf32>
    %cst_24 = arith.constant 3.200000e+01 : f32
    %49 = vector.broadcast %cst_24 : f32 to vector<8x1xf32>
    %50 = arith.divf %48, %49 : vector<8x1xf32>
    %51 = vector.broadcast %50 : vector<8x1xf32> to vector<8x32xf32>
    %52 = arith.subf %43, %51 : vector<8x32xf32>
    %53 = arith.mulf %52, %52 : vector<8x32xf32>
    %cst_25 = arith.constant dense<0.000000e+00> : vector<8xf32>
    %54 = vector.multi_reduction <add>, %53, %cst_25 [1] : vector<8x32xf32> to vector<8xf32>
    %55 = vector.shape_cast %54 : vector<8xf32> to vector<8x1xf32>
    %cst_26 = arith.constant 3.200000e+01 : f32
    %56 = vector.broadcast %cst_26 : f32 to vector<8x1xf32>
    %57 = arith.divf %55, %56 : vector<8x1xf32>
    %58 = vector.broadcast %50 : vector<8x1xf32> to vector<8x32xf32>
    %59 = arith.subf %43, %58 : vector<8x32xf32>
    %cst_27 = arith.constant 9.99999974E-6 : f32
    %60 = vector.broadcast %cst_27 : f32 to vector<8x1xf32>
    %61 = arith.addf %57, %60 : vector<8x1xf32>
    %62 = math.rsqrt %61 : vector<8x1xf32>
    %63 = vector.broadcast %62 : vector<8x1xf32> to vector<8x32xf32>
    %64 = arith.mulf %59, %63 : vector<8x32xf32>
    %65 = vector.broadcast %3 : vector<1x32xf32> to vector<8x32xf32>
    %66 = arith.mulf %64, %65 : vector<8x32xf32>
    %67 = vector.broadcast %4 : vector<1x32xf32> to vector<8x32xf32>
    %68 = arith.addf %66, %67 : vector<8x32xf32>
    %c0_28 = arith.constant 0 : index
    %c0_29 = arith.constant 0 : index
    %69 = vector.load %arg6[%c0_28, %c0_29] : memref<8x128xf32, #tpu.memory_space<vmem>>, vector<8x32xf32>
    tpu.vector_store %arg6[%c0_28, %c0_29], %68 {strides = array<i32>} : memref<8x128xf32, #tpu.memory_space<vmem>>, vector<8x32xf32>,
    %cst_30 = arith.constant dense<0.000000e+00> : vector<8xf32>
    %70 = vector.multi_reduction <add>, %46, %cst_30 [1] : vector<8x32xf32> to vector<8xf32>
    %71 = vector.shape_cast %70 : vector<8xf32> to vector<8x1xf32>
    %cst_31 = arith.constant 3.200000e+01 : f32
    %72 = vector.broadcast %cst_31 : f32 to vector<8x1xf32>
    %73 = arith.divf %71, %72 : vector<8x1xf32>
    %74 = vector.broadcast %73 : vector<8x1xf32> to vector<8x32xf32>
    %75 = arith.subf %46, %74 : vector<8x32xf32>
    %76 = arith.mulf %75, %75 : vector<8x32xf32>
    %cst_32 = arith.constant dense<0.000000e+00> : vector<8xf32>
    %77 = vector.multi_reduction <add>, %76, %cst_32 [1] : vector<8x32xf32> to vector<8xf32>
    %78 = vector.shape_cast %77 : vector<8xf32> to vector<8x1xf32>
    %cst_33 = arith.constant 3.200000e+01 : f32
    %79 = vector.broadcast %cst_33 : f32 to vector<8x1xf32>
    %80 = arith.divf %78, %79 : vector<8x1xf32>
    %81 = vector.broadcast %73 : vector<8x1xf32> to vector<8x32xf32>
    %82 = arith.subf %46, %81 : vector<8x32xf32>
    %cst_34 = arith.constant 9.99999974E-6 : f32
    %83 = vector.broadcast %cst_34 : f32 to vector<8x1xf32>
    %84 = arith.addf %80, %83 : vector<8x1xf32>
    %85 = math.rsqrt %84 : vector<8x1xf32>
    %86 = vector.broadcast %85 : vector<8x1xf32> to vector<8x32xf32>
    %87 = arith.mulf %82, %86 : vector<8x32xf32>
    %88 = vector.broadcast %5 : vector<1x32xf32> to vector<8x32xf32>
    %89 = arith.mulf %87, %88 : vector<8x32xf32>
    %90 = vector.broadcast %6 : vector<1x32xf32> to vector<8x32xf32>
    %91 = arith.addf %89, %90 : vector<8x32xf32>
    %c0_35 = arith.constant 0 : index
    %c32 = arith.constant 32 : index
    %92 = vector.load %arg6[%c0_35, %c32] : memref<8x128xf32, #tpu.memory_space<vmem>>, vector<8x32xf32>
    tpu.vector_store %arg6[%c0_35, %c32], %91 {strides = array<i32>} : memref<8x128xf32, #tpu.memory_space<vmem>>, vector<8x32xf32>,
    %93 = vector.extract_strided_slice %19 {offsets = [0, 8], sizes = [128, 8], strides = [1, 1]} : vector<128x16xf32> to vector<128x8xf32>
    %94 = vector.extract_strided_slice %18 {offsets = [8, 0], sizes = [8, 128], strides = [1, 1]} : vector<16x128xf32> to vector<8x128xf32>
    %cst_36 = arith.constant dense<0.000000e+00> : vector<128x128xf32>
    %95 = tpu.matmul %93, %94, %cst_36 {dimension_numbers = #tpu.dot_dimension_numbers<[1], [0], [0], [1], [0, 0, 1, 1], [], []>} : vector<128x8xf32>, vector<8x128xf32>, vector<128x128xf32> -> vector<128x128xf32>
    %96 = arith.addf %95, %20 : vector<128x128xf32>
    %cst_37 = arith.constant dense<0xFF800000> : vector<128xf32>
    %97 = vector.multi_reduction <maximumf>, %96, %cst_37 [0] : vector<128x128xf32> to vector<128xf32>
    %98 = vector.shape_cast %97 : vector<128xf32> to vector<1x128xf32>
    %99 = vector.broadcast %98 : vector<1x128xf32> to vector<128x128xf32>
    %100 = arith.subf %96, %99 : vector<128x128xf32>
    %101 = math.exp %100 : vector<128x128xf32>
    %cst_38 = arith.constant dense<0.000000e+00> : vector<128xf32>
    %102 = vector.multi_reduction <add>, %101, %cst_38 [0] : vector<128x128xf32> to vector<128xf32>
    %103 = vector.shape_cast %102 : vector<128xf32> to vector<1x128xf32>
    %104 = tpu.reciprocal %103 : vector<1x128xf32> -> vector<1x128xf32>
    %105 = vector.broadcast %104 : vector<1x128xf32> to vector<128x128xf32>
    %106 = arith.mulf %101, %105 : vector<128x128xf32>
    %107 = vector.extract_strided_slice %13 {offsets = [8, 0], sizes = [8, 128], strides = [1, 1]} : vector<16x128xf32> to vector<8x128xf32>
    %cst_39 = arith.constant dense<0.000000e+00> : vector<8x128xf32>
    %108 = tpu.matmul %107, %106, %cst_39 {dimension_numbers = #tpu.dot_dimension_numbers<[1], [0], [0], [1], [0, 0, 1, 1], [], []>} : vector<8x128xf32>, vector<128x128xf32>, vector<8x128xf32> -> vector<8x128xf32>
    %cst_40 = arith.constant dense<0.000000e+00> : vector<8x64xf32>
    %109 = tpu.matmul %108, %21, %cst_40 {dimension_numbers = #tpu.dot_dimension_numbers<[1], [0], [0], [1], [0, 0, 1, 1], [], []>} : vector<8x128xf32>, vector<128x64xf32>, vector<8x64xf32> -> vector<8x64xf32>
    %110 = vector.broadcast %2 : vector<1x64xf32> to vector<8x64xf32>
    %111 = arith.addf %109, %110 : vector<8x64xf32>
    %112 = vector.extract_strided_slice %0 {offsets = [8, 0], sizes = [8, 32], strides = [1, 1]} : vector<16x96xf32> to vector<8x32xf32>
    %113 = vector.extract_strided_slice %111 {offsets = [0, 0], sizes = [8, 32], strides = [1, 1]} : vector<8x64xf32> to vector<8x32xf32>
    %114 = arith.addf %112, %113 : vector<8x32xf32>
    %115 = vector.extract_strided_slice %0 {offsets = [8, 32], sizes = [8, 32], strides = [1, 1]} : vector<16x96xf32> to vector<8x32xf32>
    %116 = vector.extract_strided_slice %111 {offsets = [0, 32], sizes = [8, 32], strides = [1, 1]} : vector<8x64xf32> to vector<8x32xf32>
    %117 = arith.addf %115, %116 : vector<8x32xf32>
    %cst_41 = arith.constant dense<0.000000e+00> : vector<8xf32>
    %118 = vector.multi_reduction <add>, %114, %cst_41 [1] : vector<8x32xf32> to vector<8xf32>
    %119 = vector.shape_cast %118 : vector<8xf32> to vector<8x1xf32>
    %cst_42 = arith.constant 3.200000e+01 : f32
    %120 = vector.broadcast %cst_42 : f32 to vector<8x1xf32>
    %121 = arith.divf %119, %120 : vector<8x1xf32>
    %122 = vector.broadcast %121 : vector<8x1xf32> to vector<8x32xf32>
    %123 = arith.subf %114, %122 : vector<8x32xf32>
    %124 = arith.mulf %123, %123 : vector<8x32xf32>
    %cst_43 = arith.constant dense<0.000000e+00> : vector<8xf32>
    %125 = vector.multi_reduction <add>, %124, %cst_43 [1] : vector<8x32xf32> to vector<8xf32>
    %126 = vector.shape_cast %125 : vector<8xf32> to vector<8x1xf32>
    %cst_44 = arith.constant 3.200000e+01 : f32
    %127 = vector.broadcast %cst_44 : f32 to vector<8x1xf32>
    %128 = arith.divf %126, %127 : vector<8x1xf32>
    %129 = vector.broadcast %121 : vector<8x1xf32> to vector<8x32xf32>
    %130 = arith.subf %114, %129 : vector<8x32xf32>
    %cst_45 = arith.constant 9.99999974E-6 : f32
    %131 = vector.broadcast %cst_45 : f32 to vector<8x1xf32>
    %132 = arith.addf %128, %131 : vector<8x1xf32>
    %133 = math.rsqrt %132 : vector<8x1xf32>
    %134 = vector.broadcast %133 : vector<8x1xf32> to vector<8x32xf32>
    %135 = arith.mulf %130, %134 : vector<8x32xf32>
    %136 = vector.broadcast %3 : vector<1x32xf32> to vector<8x32xf32>
    %137 = arith.mulf %135, %136 : vector<8x32xf32>
    %138 = vector.broadcast %4 : vector<1x32xf32> to vector<8x32xf32>
    %139 = arith.addf %137, %138 : vector<8x32xf32>
    %c0_46 = arith.constant 0 : index
    %c64 = arith.constant 64 : index
    %140 = vector.load %arg6[%c0_46, %c64] : memref<8x128xf32, #tpu.memory_space<vmem>>, vector<8x32xf32>
    tpu.vector_store %arg6[%c0_46, %c64], %139 {strides = array<i32>} : memref<8x128xf32, #tpu.memory_space<vmem>>, vector<8x32xf32>,
    %cst_47 = arith.constant dense<0.000000e+00> : vector<8xf32>
    %141 = vector.multi_reduction <add>, %117, %cst_47 [1] : vector<8x32xf32> to vector<8xf32>
    %142 = vector.shape_cast %141 : vector<8xf32> to vector<8x1xf32>
    %cst_48 = arith.constant 3.200000e+01 : f32
    %143 = vector.broadcast %cst_48 : f32 to vector<8x1xf32>
    %144 = arith.divf %142, %143 : vector<8x1xf32>
    %145 = vector.broadcast %144 : vector<8x1xf32> to vector<8x32xf32>
    %146 = arith.subf %117, %145 : vector<8x32xf32>
    %147 = arith.mulf %146, %146 : vector<8x32xf32>
    %cst_49 = arith.constant dense<0.000000e+00> : vector<8xf32>
    %148 = vector.multi_reduction <add>, %147, %cst_49 [1] : vector<8x32xf32> to vector<8xf32>
    %149 = vector.shape_cast %148 : vector<8xf32> to vector<8x1xf32>
    %cst_50 = arith.constant 3.200000e+01 : f32
    %150 = vector.broadcast %cst_50 : f32 to vector<8x1xf32>
    %151 = arith.divf %149, %150 : vector<8x1xf32>
    %152 = vector.broadcast %144 : vector<8x1xf32> to vector<8x32xf32>
    %153 = arith.subf %117, %152 : vector<8x32xf32>
    %cst_51 = arith.constant 9.99999974E-6 : f32
    %154 = vector.broadcast %cst_51 : f32 to vector<8x1xf32>
    %155 = arith.addf %151, %154 : vector<8x1xf32>
    %156 = math.rsqrt %155 : vector<8x1xf32>
    %157 = vector.broadcast %156 : vector<8x1xf32> to vector<8x32xf32>
    %158 = arith.mulf %153, %157 : vector<8x32xf32>
    %159 = vector.broadcast %5 : vector<1x32xf32> to vector<8x32xf32>
    %160 = arith.mulf %158, %159 : vector<8x32xf32>
    %161 = vector.broadcast %6 : vector<1x32xf32> to vector<8x32xf32>
    %162 = arith.addf %160, %161 : vector<8x32xf32>
    %c0_52 = arith.constant 0 : index
    %c96 = arith.constant 96 : index
    %163 = vector.load %arg6[%c0_52, %c96] : memref<8x128xf32, #tpu.memory_space<vmem>>, vector<8x32xf32>
    tpu.vector_store %arg6[%c0_52, %c96], %162 {strides = array<i32>} : memref<8x128xf32, #tpu.memory_space<vmem>>, vector<8x32xf32>,
    return
  }
}

</mosaic_0001>

<bundles_post_ra>
// kernel: crosspath_pallas.1
= control target key start
LH: loop header
LB: loop body
LE: loop exit
PB: predicated region body
PF: predicated region fallthrough
CT: control target
= control target key end

     0   :  { %11 = vsyncpa [#allocation3], 0  ;;  %s1847_s0 = inlined_call_operand.vmem [shape: f32[16,96], index: 0, kind: input, shape index: {}]   ;;  %s1848_s1 = inlined_call_operand.vmem [shape: f32[96,224], index: 1, kind: input, shape index: {}]   ;;  %s1849_s2 = inlined_call_operand.hbm [shape: f32[96,256], index: 2, kind: input, shape index: {}]   ;;  %s1850_s3 = inlined_call_operand.vmem [shape: f32[128,64], index: 3, kind: input, shape index: {}]   ;;  %s1851_s4 = inlined_call_operand.vmem [shape: f32[1,416], index: 4, kind: input, shape index: {}]   ;;  %s1852_s5 = inlined_call_operand.hbm [shape: f32[128,128], index: 5, kind: input, shape index: {}]   ;;  %s1853_s6 = inlined_call_operand.vmem [shape: f32[8,128], index: 6, kind: output, shape index: {}]  }
   0x1   :  { %s21_s23 = sshll.u32 %s1849_s2, 4  ;;  %s22_s23 = int_to_ptr.hbm [resolvable:$true] %s21_s23 }
   0x2   :  { %12 = vsyncpa [#allocation5], 0  ;;  %s1202_s24 = smov [#allocation2]   ;;  %s38_s28 = sshll.u32 %s1852_s5, 4  ;;  %s39_s28 = int_to_ptr.hbm [resolvable:$true] %s38_s28 }
   0x3   :  { %s23_s25 = sshll.u32 %s1202_s24, 4  ;;  %s1203_s29 = smov 256   ;;  %s24_s25 = int_to_ptr.vmem [resolvable:$true] %s23_s25 }
   0x4   :  { %s1204_s30 = smov 16   ;;  %s1205_s7 = smov [#allocation4]  }
   0x5   :  { %29 = dma.hbm_to_vmem [thread:$0]  %s22_s23, 3072, %s24_s25, [#allocation3], %s1203_s29, %s1203_s29, %s1204_s30  }
   0x6   :  { %s40_s8 = sshll.u32 %s1205_s7, 4  ;;  %s1206_s9 = smov 128   ;;  %s41_s8 = int_to_ptr.vmem [resolvable:$true] %s40_s8 }
   0x7   :  { %s1207_s10 = smov 8  }
   0x8   :  { %46 = dma.hbm_to_vmem [thread:$0]  %s39_s28, 2048, %s41_s8, [#allocation5], %s1206_s9, %s1206_s9, %s1207_s10  }
   0x9   :  { %1198 = dma.done.wait [#allocation3], 3072  }
   0xa   :  { %1199 = vsyncadd [#allocation3], 4294964224 }
   0xb   :  { %1200 = dma.done.wait [#allocation5], 2048  }
   0xc   :  { %1201 = vsyncadd [#allocation5], 4294965248  ;;  %v84_v0 = vld [vmem:[%s1848_s1 + $0xb8] sm:$0xff]  ;;  %v82_v1 = vld [vmem:[%s1848_s1 + $0xa8] sm:$0xff]  ;;  %vm90_vm0 = vcmask 785408   ;;  %vm287_vm1 = vcmask 64512  }
   0xd   :  { %124 = vmatpush.msra.mxu1 %v84_v0  ;;  %v80_v2 = vld [vmem:[%s1848_s1 + $0x98] sm:$0xff]  ;;  %v78_v3 = vld [vmem:[%s1848_s1 + $0x88] sm:$0xff]  ;;  %v169_v4 = vld [vmem:[#allocation2 + $0xb0] sm:$0xff]  ;;  %s1209_s18 = smov 32   ;;  %vm548_vm6 = vcmask 261120   ;;  %s1210_s19 = smov 96  }
   0xe   :  { %181 = vmatpush.msra.mxu2 %v169_v4  ;;  %v170_v5 = vld [vmem:[#allocation2 + $0xb8] sm:$0xff]  ;;  %v167_v6 = vld [vmem:[#allocation2 + $0xa0] sm:$0xff]  ;;  %v168_v7 = vld [vmem:[#allocation2 + $0xa8] sm:$0xff]  ;;  %s1212_s25 = smov 64  }
   0xf   :  { %125 = vmatpush.msra.mxu1 %v82_v1  ;;  %v76_v8 = vld [vmem:[%s1848_s1 + $0x78] sm:$0xff]  ;;  %204 = vmatpush.msra.mxu3 %v170_v5  ;;  %v165_v9 = vld [vmem:[#allocation2 + $0x90] sm:$0xff]  ;;  %v74_v11 = vld [vmem:[%s1848_s1 + $0x68] sm:$0xff] }
  0x10   :  { %182 = vmatpush.msra.mxu2 %v167_v6  ;;  %v166_v10 = vld [vmem:[#allocation2 + $0x98] sm:$0xff]  ;;  %v163_v12 = vld [vmem:[#allocation2 + $0x80] sm:$0xff]  ;;  %v164_v13 = vld [vmem:[#allocation2 + $0x88] sm:$0xff] }
  0x11   :  { %126 = vmatpush.msra.mxu1 %v80_v2  ;;  %205 = vmatpush.msra.mxu3 %v168_v7  ;;  %v72_v14 = vld [vmem:[%s1848_s1 + $0x58] sm:$0xff]  ;;  %v161_v15 = vld [vmem:[#allocation2 + $0x70] sm:$0xff]  ;;  %v70_v17 = vld [vmem:[%s1848_s1 + $0x48] sm:$0xff] }
  0x12   :  { %183 = vmatpush.msra.mxu2 %v165_v9  ;;  %v162_v16 = vld [vmem:[#allocation2 + $0x78] sm:$0xff]  ;;  %v159_v18 = vld [vmem:[#allocation2 + $0x60] sm:$0xff]  ;;  %v160_v19 = vld [vmem:[#allocation2 + $0x68] sm:$0xff] }
  0x13   :  { %127 = vmatpush.msra.mxu1 %v78_v3  ;;  %206 = vmatpush.msra.mxu3 %v166_v10  ;;  %v68_v20 = vld [vmem:[%s1848_s1 + $0x38] sm:$0xff]  ;;  %v157_v21 = vld [vmem:[#allocation2 + $0x50] sm:$0xff]  ;;  %v66_v23 = vld [vmem:[%s1848_s1 + $0x28] sm:$0xff] }
  0x14   :  { %184 = vmatpush.msra.mxu2 %v163_v12  ;;  %v158_v22 = vld [vmem:[#allocation2 + $0x58] sm:$0xff]  ;;  %v155_v24 = vld [vmem:[#allocation2 + $0x40] sm:$0xff]  ;;  %v156_v25 = vld [vmem:[#allocation2 + $0x48] sm:$0xff] }
  0x15   :  { %128 = vmatpush.msra.mxu1 %v76_v8  ;;  %207 = vmatpush.msra.mxu3 %v164_v13  ;;  %v64_v26 = vld [vmem:[%s1848_s1 + $0x18] sm:$0xff]  ;;  %v153_v27 = vld [vmem:[#allocation2 + $0x30] sm:$0xff]  ;;  %v62_v29 = vld [vmem:[%s1848_s1 + $0x8] sm:$0xff] }
  0x16   :  { %185 = vmatpush.msra.mxu2 %v161_v15  ;;  %v154_v28 = vld [vmem:[#allocation2 + $0x38] sm:$0xff]  ;;  %v1293_v30 = vld [vmem:[%s1847_s0] sm:$0xff]  ;;  %v1300_v31 = vld [vmem:[%s1847_s0 + $0x8] sm:$0xff] }
  0x17   :  { %129 = vmatpush.msra.mxu1 %v74_v11  ;;  %208 = vmatpush.msra.mxu3 %v162_v16  ;;  %v151_v32 = vld [vmem:[#allocation2 + $0x20] sm:$0xff]  ;;  %v152_v33 = vld [vmem:[#allocation2 + $0x28] sm:$0xff]  ;;  %v149_v34 = vld [vmem:[#allocation2 + $0x10] sm:$0xff] }
  0x18   :  { %186 = vmatpush.msra.mxu2 %v159_v18  ;;  %v150_v35 = vld [vmem:[#allocation2 + $0x18] sm:$0xff]  ;;  %v147_v36 = vld [vmem:[#allocation2] sm:$0xff]  ;;  %v148_v37 = vld [vmem:[#allocation2 + $0x8] sm:$0xff] }
  0x19   :  { %130 = vmatpush.msra.mxu1 %v72_v14  ;;  %209 = vmatpush.msra.mxu3 %v160_v19  ;;  %v83_v38 = vld [vmem:[%s1848_s1 + $0xb0] sm:$0xff]  ;;  %v1310_v39 = vld [vmem:[%s1850_s3 + $0x78] sm:$0xff]  ;;  %v81_v40 = vld [vmem:[%s1848_s1 + $0xa0] sm:$0xff] }
  0x1a   :  { %187 = vmatpush.msra.mxu2 %v157_v21  ;;  %101 = vmatpush.msra.mxu0 %v83_v38  ;;  %v1319_v41 = vld [vmem:[%s1850_s3 + $0x70] sm:$0xff]  ;;  %v1327_v43 = vld [vmem:[%s1850_s3 + $0x68] sm:$0xff]  ;;  %v77_v44 = vld [vmem:[%s1848_s1 + $0x80] sm:$0xff] }
  0x1b   :  { %131 = vmatpush.msra.mxu1 %v70_v17  ;;  %210 = vmatpush.msra.mxu3 %v158_v22  ;;  %v79_v42 = vld [vmem:[%s1848_s1 + $0x90] sm:$0xff]  ;;  %v1336_v45 = vld [vmem:[%s1850_s3 + $0x60] sm:$0xff]  ;;  %v1345_v47 = vld [vmem:[%s1850_s3 + $0x58] sm:$0xff] }
  0x1c   :  { %188 = vmatpush.msra.mxu2 %v155_v24  ;;  %102 = vmatpush.msra.mxu0 %v81_v40  ;;  %v75_v46 = vld [vmem:[%s1848_s1 + $0x70] sm:$0xff]  ;;  %v73_v48 = vld [vmem:[%s1848_s1 + $0x60] sm:$0xff]  ;;  %v1363_v51 = vld [vmem:[%s1850_s3 + $0x48] sm:$0xff] }
  0x1d   :  { %132 = vmatpush.msra.mxu1 %v68_v20  ;;  %211 = vmatpush.msra.mxu3 %v156_v25  ;;  %v1354_v49 = vld [vmem:[%s1850_s3 + $0x50] sm:$0xff]  ;;  %v69_v52 = vld [vmem:[%s1848_s1 + $0x40] sm:$0xff]  ;;  %v1386_v56 = vld [vmem:[%s1850_s3 + $0x38] sm:$0xff] }
  0x1e   :  { %189 = vmatpush.msra.mxu2 %v153_v27  ;;  %103 = vmatpush.msra.mxu0 %v79_v42  ;;  %v71_v50 = vld [vmem:[%s1848_s1 + $0x50] sm:$0xff]  ;;  %v1372_v53 = vld [vmem:[%s1850_s3 + $0x40] sm:$0xff]  ;;  %v1405_v61 = vld [vmem:[%s1850_s3 + $0x28] sm:$0xff] }
  0x1f   :  { %133 = vmatpush.msra.mxu1 %v66_v23  ;;  %212 = vmatpush.msra.mxu3 %v154_v28  ;;  %v1377_v54 = vld [vmem:[%s1851_s4] sm:$0x3]  ;;  %v67_v55 = vld [vmem:[%s1848_s1 + $0x30] sm:$0xff]  ;;  %v1429_v6 = vld [vmem:[%s1850_s3 + $0x18] sm:$0xff] }
  0x20   :  { %190 = vmatpush.msra.mxu2 %v151_v32  ;;  %104 = vmatpush.msra.mxu0 %v77_v44  ;;  %v87_v57 = vperm.slane %v1377_v54, 1  ;;  %v65_v58 = vld [vmem:[%s1848_s1 + $0x20] sm:$0xff]  ;;  %v1396_v59 = vld [vmem:[%s1850_s3 + $0x30] sm:$0xff]  ;;  %v1440_v8 = vld [vmem:[%s1850_s3 + $0x8] sm:$0xff] }
  0x21   :  { %134 = vmatpush.msra.mxu1 %v64_v26  ;;  %213 = vmatpush.msra.mxu3 %v152_v33  ;;  %v63_v60 = vld [vmem:[%s1848_s1 + $0x10] sm:$0xff]  ;;  %v61_v0 = vld [vmem:[%s1848_s1] sm:$0xff]  ;;  %v1854_v26 = vperm.slane %v1377_v54, 0 }
  0x22   :  { %191 = vmatpush.msra.mxu2 %v149_v34  ;;  %105 = vmatpush.msra.mxu0 %v75_v46  ;;  %v1423_v5 = vld [vmem:[%s1850_s3 + $0x20] sm:$0xff]  ;;  %v1434_v7 = vld [vmem:[%s1850_s3 + $0x10] sm:$0xff] }
  0x23   :  { %135 = vmatpush.msra.mxu1 %v62_v29  ;;  %214 = vmatpush.msra.mxu3 %v150_v35  ;;  %v1447_v9 = vld [vmem:[%s1850_s3] sm:$0xff]  ;;  %s1208_s3 = smov 120  }
  0x24   :  { %1017 = vmatmul.msk.f32.vlgmr.msra.gmra.mxu1 %vm90_vm0, %v1293_v30  ;;  %192 = vmatpush.msra.mxu2 %v147_v36 }
  0x25   :  { %215 = vmatpush.msra.mxu3 %v148_v37  ;;  %106 = vmatpush.msra.mxu0 %v73_v48 }
  0x26   :  { %551 = vmatpush.msrb.mxu2 %v1310_v39 }
  0x27   :  { %107 = vmatpush.msra.mxu0 %v71_v50 }
  0x28   :  { %552 = vmatpush.msrb.mxu2 %v1319_v41 }
  0x29   :  { %108 = vmatpush.msra.mxu0 %v69_v52 }
  0x2a   :  { %553 = vmatpush.msrb.mxu2 %v1327_v43 }
  0x2b   :  { %109 = vmatpush.msra.mxu0 %v67_v55 }
  0x2c   :  { %1018 = vmatmul.msk.f32.gmra.mxu1 %vm90_vm0, %v1300_v31  ;;  %554 = vmatpush.msrb.mxu2 %v1336_v45 }
  0x2d   :  { %110 = vmatpush.msra.mxu0 %v65_v58 }
  0x2e   :  { %555 = vmatpush.msrb.mxu2 %v1345_v47 }
  0x2f   :  { %111 = vmatpush.msra.mxu0 %v63_v60 }
  0x30   :  { %556 = vmatpush.msrb.mxu2 %v1354_v49 }
  0x31   :  { %112 = vmatpush.msra.mxu0 %v61_v0 }
  0x32   :  { %557 = vmatpush.msrb.mxu2 %v1363_v51  ;;  %1015 = vmatmul.msk.f32.vlgmr.msra.gmra.mxu0 %vm90_vm0, %v1293_v30 }
  0x34   :  { %558 = vmatpush.msrb.mxu2 %v1372_v53 }
  0x36   :  { %559 = vmatpush.msrb.mxu2 %v1386_v56 }
  0x38   :  { %560 = vmatpush.msrb.mxu2 %v1396_v59 }
  0x3a   :  { %561 = vmatpush.msrb.mxu2 %v1405_v61  ;;  %1016 = vmatmul.msk.f32.gmra.mxu0 %vm90_vm0, %v1300_v31 }
  0x3c   :  { %562 = vmatpush.msrb.mxu2 %v1423_v5 }
  0x3e   :  { %563 = vmatpush.msrb.mxu2 %v1429_v6 }
  0x40   :  { %564 = vmatpush.msrb.mxu2 %v1434_v7 }
  0x42   :  { %565 = vmatpush.msrb.mxu2 %v1440_v8 }
  0x44   :  { %566 = vmatpush.msrb.mxu2 %v1447_v9 }
  0xa1   :  { %v137_v62 = vpop.f32.mrf.mxu1 }
  0xa2   :  { %v138_v63 = vadd.f32 %v137_v62, %v87_v57 }
  0xa4   :  { %v144_v1 = vmax.f32 %v138_v63, 0.0 }
  0xa6   :  { %1019 = vmatmul.msk.f32.vlgmr.msra.gmra.mxu2 %vm90_vm0, %v144_v1  ;;  %1021 = vmatmul.msk.f32.vlgmr.msra.gmra.mxu3 %vm90_vm0, %v144_v1 }
  0xa9   :  { %v140_v2 = vpop.f32.mrf.mxu1 }
  0xaa   :  { %v141_v3 = vadd.f32 %v140_v2, %v87_v57  ;;  %v1502_v2 = vld [vmem:[#allocation4 + $0x20] sm:$0xff] }
  0xab   :  { %1862 = vst [vmem:[#allocation9_spill] sm:$0xff] %v1502_v2 }
  0xac   :  { %v146_v4 = vmax.f32 %v141_v3, 0.0  ;;  %v1504_v3 = vld [vmem:[#allocation4 + $0x28] sm:$0xff] }
  0xae   :  { %1020 = vmatmul.msk.f32.gmra.mxu2 %vm90_vm0, %v146_v4  ;;  %1022 = vmatmul.msk.f32.gmra.mxu3 %vm90_vm0, %v146_v4 }
  0xaf   :  { %v1466_v24 = vpop.f32.mrf.mxu0 }
  0xb7   :  { %v117_v27 = vpop.f32.mrf.mxu0 }
  0xb8   :  { %v1474_v28 = vadd.f32 %v117_v27, %v1854_v26 }
  0xba   :  { %1861 = vst [vmem:[#allocation8_spill] sm:$0xff] %v1474_v28 }
 0x129   :  { %v194_v10 = vpop.f32.mrf.mxu2  ;;  %v217_v11 = vpop.f32.mrf.mxu3 }
 0x12a   :  { %351 = vmatpush.msrb.mxu0 %v217_v11  ;;  %1055 = vmatpush.msrb.mxu1 %v217_v11  ;;  %v1508_v11 = vld [vmem:[#allocation4 + $0x8] sm:$0xff] }
 0x12b   :  { %223 = vxpose.xlu0.b32.start [1/2] (short) %v194_v10, 128  ;;  %v1506_v10 = vld [vmem:[#allocation4] sm:$0xff]  ;;  %1864 = vst [vmem:[#allocation11_spill] sm:$0xff] %v1508_v11 }
 0x12c   :  { %1863 = vst [vmem:[#allocation10_spill] sm:$0xff] %v1506_v10 }
 0x131   :  { %v197_v12 = vpop.f32.mrf.mxu2  ;;  %v220_v13 = vpop.f32.mrf.mxu3 }
 0x132   :  { %730 = vmatpush.msra.mxu2 %v220_v13  ;;  %1056 = vmatpush.msrb.mxu3 %v220_v13  ;;  %v1512_v13 = vld [vmem:[#allocation4 + $0x48] sm:$0xff] }
 0x133   :  { %224 = vxpose.xlu0.b32.end [2/2] (short) %v197_v12, 128  ;;  %v1510_v12 = vld [vmem:[#allocation4 + $0x40] sm:$0xff] }
 0x1cf   :  { %v239_v14 = vpop.trf.xlu0 }
 0x1d0   :  { %1023 = vmatmul.msk.f32.vlgmr.msrb.gmra.mxu0 %vm287_vm1, %v239_v14 }
 0x1d7   :  { %v240_v15 = vpop.trf.xlu0 }
 0x1d8   :  { %1024 = vmatmul.msk.f32.gmra.mxu0 %vm287_vm1, %v240_v15 }
 0x1df   :  { %v241_v16 = vpop.trf.xlu0 }
 0x1e0   :  { %1025 = vmatmul.msk.f32.gmra.mxu0 %vm287_vm1, %v241_v16 }
 0x1e7   :  { %v242_v17 = vpop.trf.xlu0 }
 0x1e8   :  { %1026 = vmatmul.msk.f32.gmra.mxu0 %vm287_vm1, %v242_v17 }
 0x1ef   :  { %v243_v18 = vpop.trf.xlu0 }
 0x1f0   :  { %1027 = vmatmul.msk.f32.gmra.mxu0 %vm287_vm1, %v243_v18 }
 0x1f7   :  { %v244_v19 = vpop.trf.xlu0 }
 0x1f8   :  { %661 = vrot.lane.b32.xlu1 %v244_v19, %s1208_s3  ;;  %1028 = vmatmul.msk.f32.gmra.mxu0 %vm287_vm1, %v244_v19 }
 0x1ff   :  { %v245_v20 = vpop.trf.xlu0 }
 0x200   :  { %663 = vrot.lane.b32.xlu1 %v245_v20, %s1208_s3  ;;  %1029 = vmatmul.msk.f32.gmra.mxu0 %vm287_vm1, %v245_v20 }
 0x207   :  { %v246_v21 = vpop.trf.xlu0 }
 0x208   :  { %665 = vrot.lane.b32.xlu2 %v246_v21, %s1208_s3  ;;  %1030 = vmatmul.msk.f32.gmra.mxu0 %vm287_vm1, %v246_v21 }
 0x20f   :  { %v247_v22 = vpop.trf.xlu0 }
 0x210   :  { %667 = vrot.lane.b32.xlu2 %v247_v22, %s1208_s3  ;;  %1031 = vmatmul.msk.f32.gmra.mxu0 %vm287_vm1, %v247_v22 }
 0x217   :  { %v248_v23 = vpop.trf.xlu0 }
 0x218   :  { %651 = vrot.lane.b32.xlu2 %v239_v14, %s1208_s3  ;;  %669 = vrot.lane.b32.xlu0 %v248_v23, %s1208_s3 }
 0x219   :  { %1032 = vmatmul.msk.f32.gmra.mxu0 %vm287_vm1, %v248_v23  ;;  %v1530_v23 = vld [vmem:[#allocation4 + $0x68] sm:$0xff] }
 0x21f   :  { %v249_v25 = vpop.trf.xlu0 }
 0x220   :  { %653 = vrot.lane.b32.xlu2 %v240_v15, %s1208_s3  ;;  %671 = vrot.lane.b32.xlu1 %v249_v25, %s1208_s3 }
 0x221   :  { %1033 = vmatmul.msk.f32.gmra.mxu0 %vm287_vm1, %v249_v25 }
 0x227   :  { %v250_v29 = vpop.trf.xlu0 }
 0x228   :  { %655 = vrot.lane.b32.xlu2 %v241_v16, %s1208_s3  ;;  %1034 = vmatmul.msk.f32.vlgmr.msrb.gmra.mxu1 %vm287_vm1, %v250_v29 }
 0x229   :  { %673 = vrot.lane.b32.xlu1 %v250_v29, %s1208_s3 }
 0x22f   :  { %v251_v31 = vpop.trf.xlu0 }
 0x230   :  { %657 = vrot.lane.b32.xlu2 %v242_v17, %s1208_s3  ;;  %1035 = vmatmul.msk.f32.gmra.mxu1 %vm287_vm1, %v251_v31  ;;  %v1520_v17 = vld [vmem:[#allocation4 + $0x60] sm:$0xff] }
 0x231   :  { %675 = vrot.lane.b32.xlu1 %v251_v31, %s1208_s3 }
 0x237   :  { %v252_v32 = vpop.trf.xlu0 }
 0x238   :  { %659 = vrot.lane.b32.xlu2 %v243_v18, %s1208_s3  ;;  %1036 = vmatmul.msk.f32.gmra.mxu1 %vm287_vm1, %v252_v32 }
 0x239   :  { %677 = vrot.lane.b32.xlu1 %v252_v32, %s1208_s3 }
 0x23f   :  { %v253_v33 = vpop.trf.xlu0 }
 0x240   :  { %1037 = vmatmul.msk.f32.gmra.mxu1 %vm287_vm1, %v253_v33 }
 0x241   :  { %679 = vrot.lane.b32.xlu1 %v253_v33, %s1208_s3 }
 0x247   :  { %v254_v34 = vpop.trf.xlu0 }
 0x248   :  { %1038 = vmatmul.msk.f32.gmra.mxu1 %vm287_vm1, %v254_v34 }
 0x249   :  { %681 = vrot.lane.b32.xlu1 %v254_v34, %s1208_s3 }
 0x24d   :  { %v353_v35 = vpop.f32.mrf.mxu0 }
 0x24e   :  { %v354_v18 = vadd.f32 %v353_v35, %v1506_v10 }
 0x255   :  { %v356_v36 = vpop.f32.mrf.mxu0 }
 0x256   :  { %v357_v19 = vadd.f32 %v356_v36, %v1508_v11 }
 0x25d   :  { %v1489_v37 = vpop.f32.mrf.mxu0 }
 0x262   :  { %v666_v44 = vpop.permute.xlu2 %665 }
 0x265   :  { %v1492_v42 = vpop.f32.mrf.mxu0 }
 0x26a   :  { %v662_v38 = vpop.permute.xlu1 %661  ;;  %v668_v48 = vpop.permute.xlu2 %667 }
 0x26b   :  { %1044 = vmatmul.msk.f32.vlgmr.msrb.gmra.mxu3 %vm287_vm1, %v662_v38 }
 0x26d   :  { %v365_v46 = vpop.f32.mrf.mxu0 }
 0x26e   :  { %v1515_v15 = vadd.f32 %v365_v46, %v1502_v2  ;;  %v1548_v46 = vld [vmem:[#allocation4 + $0x38] sm:$0xff] }
 0x270   :  { %v401_v25 = vmax.f32 %v354_v18, %v1515_v15 }
 0x272   :  { %v664_v40 = vpop.permute.xlu1 %663 }
 0x273   :  { %1045 = vmatmul.msk.f32.gmra.mxu3 %vm287_vm1, %v664_v40 }
 0x275   :  { %v368_v50 = vpop.f32.mrf.mxu0 }
 0x276   :  { %v1518_v16 = vadd.f32 %v368_v50, %v1504_v3  ;;  %v1550_v50 = vld [vmem:[#allocation4 + $0x10] sm:$0xff] }
 0x277   :  { %1865 = vst [vmem:[#allocation12_spill] sm:$0xff] %v1550_v50 }
 0x278   :  { %v402_v27 = vmax.f32 %v357_v19, %v1518_v16 }
 0x27b   :  { %1046 = vmatmul.msk.f32.gmra.mxu3 %vm287_vm1, %v666_v44  ;;  %v1546_v44 = vld [vmem:[#allocation4 + $0x30] sm:$0xff] }
 0x27d   :  { %v371_v55 = vpop.f32.mrf.mxu0 }
 0x283   :  { %1047 = vmatmul.msk.f32.gmra.mxu3 %vm287_vm1, %v668_v48 }
 0x285   :  { %v374_v58 = vpop.f32.mrf.mxu0 }
 0x28a   :  { %v670_v52 = vpop.permute.xlu0 %669 }
 0x28b   :  { %1048 = vmatmul.msk.f32.gmra.mxu3 %vm287_vm1, %v670_v52  ;;  %v1552_v52 = vld [vmem:[#allocation4 + $0x18] sm:$0xff] }
 0x28c   :  { %1866 = vst [vmem:[#allocation13_spill] sm:$0xff] %v1552_v52 }
 0x28d   :  { %v377_v63 = vpop.f32.mrf.mxu0 }
 0x28e   :  { %v1525_v20 = vadd.f32 %v377_v63, %v1510_v12  ;;  %v372_v63 = vadd.f32 %v371_v55, %v1546_v44 }
 0x290   :  { %v405_v32 = vmax.f32 %v401_v25, %v1525_v20 }
 0x292   :  { %v672_v57 = vpop.permute.xlu1 %671 }
 0x293   :  { %1049 = vmatmul.msk.f32.gmra.mxu3 %vm287_vm1, %v672_v57  ;;  %v1554_v57 = vld [vmem:[#allocation4 + $0x50] sm:$0xff] }
 0x296   :  { %v380_v14 = vpop.f32.mrf.mxu0 }
 0x297   :  { %v1528_v21 = vadd.f32 %v380_v14, %v1512_v13  ;;  %v360_v14 = vadd.f32 %v1489_v37, %v1550_v50 }
 0x299   :  { %v406_v33 = vmax.f32 %v402_v27, %v1528_v21 }
 0x29b   :  { %v674_v60 = vpop.permute.xlu1 %673 }
 0x29c   :  { %1050 = vmatmul.msk.f32.gmra.mxu3 %vm287_vm1, %v674_v60 }
 0x29e   :  { %v383_v60 = vpop.f32.mrf.mxu0 }
 0x29f   :  { %v384_v25 = vadd.f32 %v383_v60, %v1554_v57 }
 0x2a3   :  { %v676_v62 = vpop.permute.xlu1 %675 }
 0x2a4   :  { %1051 = vmatmul.msk.f32.gmra.mxu3 %vm287_vm1, %v676_v62  ;;  %v1556_v62 = vld [vmem:[#allocation4 + $0x58] sm:$0xff] }
 0x2a5   :  { %v386_v0 = vpop.f32.mrf.mxu1 }
 0x2a6   :  { %v1568_v27 = vadd.f32 %v386_v0, %v1556_v62 }
 0x2ab   :  { %v678_v1 = vpop.permute.xlu1 %677 }
 0x2ac   :  { %1052 = vmatmul.msk.f32.gmra.mxu3 %vm287_vm1, %v678_v1  ;;  %v375_v1 = vadd.f32 %v374_v58, %v1548_v46 }
 0x2ad   :  { %v389_v4 = vpop.f32.mrf.mxu1 }
 0x2ae   :  { %v1535_v29 = vadd.f32 %v389_v4, %v1520_v17  ;;  %v1560_v4 = vld [vmem:[#allocation4 + $0x70] sm:$0xff] }
 0x2b0   :  { %v409_v35 = vmax.f32 %v405_v32, %v1535_v29  ;;  %v403_v32 = vmax.f32 %v360_v14, %v372_v63 }
 0x2b3   :  { %v680_v22 = vpop.permute.xlu1 %679 }
 0x2b4   :  { %1053 = vmatmul.msk.f32.gmra.mxu3 %vm287_vm1, %v680_v22  ;;  %v363_v22 = vadd.f32 %v1492_v42, %v1552_v52 }
 0x2b5   :  { %v392_v31 = vpop.f32.mrf.mxu1 }
 0x2b6   :  { %v1541_v34 = vadd.f32 %v392_v31, %v1530_v23  ;;  %v1570_v31 = vld [vmem:[#allocation4 + $0x78] sm:$0xff] }
 0x2b7   :  { %1867 = vst [vmem:[#allocation14_spill] sm:$0xff] %v1570_v31 }
 0x2b8   :  { %v410_v36 = vmax.f32 %v406_v33, %v1541_v34  ;;  %v404_v33 = vmax.f32 %v363_v22, %v375_v1 }
 0x2ba   :  { %v413_v38 = vmax.f32 %v409_v35, %v410_v36  ;;  %v407_v35 = vmax.f32 %v403_v32, %v384_v25  ;;  %v408_v36 = vmax.f32 %v404_v33, %v1568_v27 }
 0x2bb   :  { %v682_v40 = vpop.permute.xlu1 %681 }
 0x2bc   :  { %1054 = vmatmul.msk.f32.gmra.mxu3 %vm287_vm1, %v682_v40 }
 0x2bd   :  { %v395_v48 = vpop.f32.mrf.mxu1 }
 0x2be   :  { %v1573_v55 = vadd.f32 %v395_v48, %v1560_v4 }
 0x2c0   :  { %v411_v42 = vmax.f32 %v407_v35, %v1573_v55 }
 0x2c5   :  { %v398_v58 = vpop.f32.mrf.mxu1 }
 0x2c6   :  { %v1577_v37 = vadd.f32 %v398_v58, %v1570_v31 }
 0x2c8   :  { %v412_v40 = vmax.f32 %v408_v36, %v1577_v37 }
 0x2ca   :  { %v414_v0 = vmax.f32 %v411_v42, %v412_v40 }
 0x2cc   :  { %v415_v60 = vmax.f32 %v413_v38, %v414_v0 }
 0x2ce   :  { %v416_v26 = vrot.slane %v415_v60, 4 }
 0x2d0   :  { %v417_v28 = vmax.f32 %v415_v60, %v416_v26 }
 0x2d2   :  { %v418_v2 = vrot.slane %v417_v28, 2 }
 0x2d4   :  { %v419_v10 = vmax.f32 %v417_v28, %v418_v2 }
 0x2d6   :  { %v420_v52 = vrot.slane %v419_v10, 1 }
 0x2d8   :  { %v1581_v48 = vmax.f32 %v419_v10, %v420_v52 }
 0x2da   :  { %v422_v32 = vsub.f32 %v354_v18, %v1581_v48  ;;  %v423_v33 = vsub.f32 %v357_v19, %v1581_v48  ;;  %v424_v58 = vsub.f32 %v360_v14, %v1581_v48  ;;  %v425_v50 = vsub.f32 %v363_v22, %v1581_v48 }
 0x2db   :  { %v426_v38 = vsub.f32 %v1515_v15, %v1581_v48  ;;  %v427_v26 = vsub.f32 %v1518_v16, %v1581_v48  ;;  %v428_v2 = vsub.f32 %v372_v63, %v1581_v48  ;;  %v429_v18 = vsub.f32 %v375_v1, %v1581_v48 }
 0x2dc   :  { %v438_v35 = vmul.f32 1.442695, %v422_v32  ;;  %v440_v11 = vmul.f32 1.442695, %v423_v33  ;;  %v442_v36 = vmul.f32 1.442695, %v424_v58  ;;  %v430_v15 = vsub.f32 %v1525_v20, %v1581_v48 }
 0x2dd   :  { %v444_v28 = vmul.f32 1.442695, %v425_v50  ;;  %v446_v10 = vmul.f32 1.442695, %v426_v38  ;;  %v448_v19 = vmul.f32 1.442695, %v427_v26  ;;  %v431_v50 = vsub.f32 %v1528_v21, %v1581_v48 }
 0x2de   :  { %1071 = vpow2.f32 %v438_v35  ;;  %v450_v22 = vmul.f32 1.442695, %v428_v2  ;;  %v452_v63 = vmul.f32 1.442695, %v429_v18  ;;  %v432_v40 = vsub.f32 %v384_v25, %v1581_v48 }
 0x2df   :  { %1073 = vpow2.f32 %v440_v11  ;;  %v454_v20 = vmul.f32 1.442695, %v430_v15  ;;  %v433_v32 = vsub.f32 %v1568_v27, %v1581_v48  ;;  %v456_v33 = vmul.f32 1.442695, %v431_v50 }
 0x2e0   :  { %1075 = vpow2.f32 %v442_v36  ;;  %v434_v35 = vsub.f32 %v1535_v29, %v1581_v48  ;;  %v458_v25 = vmul.f32 1.442695, %v432_v40  ;;  %v435_v26 = vsub.f32 %v1541_v34, %v1581_v48 }
 0x2e1   :  { %1077 = vpow2.f32 %v444_v28  ;;  %v460_v27 = vmul.f32 1.442695, %v433_v32  ;;  %v437_v15 = vsub.f32 %v1577_v37, %v1581_v48 }
 0x2e2   :  { %1079 = vpow2.f32 %v446_v10  ;;  %v436_v10 = vsub.f32 %v1573_v55, %v1581_v48  ;;  %v462_v18 = vmul.f32 1.442695, %v434_v35 }
 0x2e3   :  { %1081 = vpow2.f32 %v448_v19  ;;  %v468_v40 = vmul.f32 1.442695, %v437_v15 }
 0x2e4   :  { %v1593_v52 = vpop.eup %1071  ;;  %1083 = vpow2.f32 %v450_v22  ;;  %v464_v22 = vmul.f32 1.442695, %v435_v26  ;;  %v466_v34 = vmul.f32 1.442695, %v436_v10 }
 0x2e5   :  { %v1595_v14 = vpop.eup %1073  ;;  %1085 = vpow2.f32 %v452_v63 }
 0x2e6   :  { %v470_v11 = vadd.f32 %v1595_v14, %v1593_v52  ;;  %v1601_v16 = vpop.eup %1075  ;;  %1087 = vpow2.f32 %v454_v20 }
 0x2e7   :  { %v1606_v42 = vpop.eup %1077  ;;  %1089 = vpow2.f32 %v456_v33 }
 0x2e8   :  { %v471_v1 = vadd.f32 %v1601_v16, %v470_v11  ;;  %v1610_v60 = vpop.eup %1079  ;;  %1091 = vpow2.f32 %v458_v25 }
 0x2e9   :  { %v1615_v58 = vpop.eup %1081  ;;  %1093 = vpow2.f32 %v460_v27 }
 0x2ea   :  { %v472_v0 = vadd.f32 %v1606_v42, %v471_v1  ;;  %v1620_v36 = vpop.eup %1083  ;;  %1095 = vpow2.f32 %v462_v18 }
 0x2eb   :  { %v1086_v2 = vpop.eup %1085  ;;  %1097 = vpow2.f32 %v464_v22 }
 0x2ec   :  { %v473_v21 = vadd.f32 %v1610_v60, %v472_v0  ;;  %v1088_v19 = vpop.eup %1087  ;;  %1099 = vpow2.f32 %v466_v34 }
 0x2ed   :  { %v1090_v50 = vpop.eup %1089  ;;  %1101 = vpow2.f32 %v468_v40 }
 0x2ee   :  { %v474_v38 = vadd.f32 %v1615_v58, %v473_v21  ;;  %v1092_v1 = vpop.eup %1091 }
 0x2ef   :  { %v1094_v0 = vpop.eup %1093 }
 0x2f0   :  { %v475_v28 = vadd.f32 %v1620_v36, %v474_v38  ;;  %v1096_v32 = vpop.eup %1095 }
 0x2f1   :  { %v1098_v21 = vpop.eup %1097 }
 0x2f2   :  { %v476_v29 = vadd.f32 %v1086_v2, %v475_v28  ;;  %v1100_v37 = vpop.eup %1099 }
 0x2f3   :  { %v1102_v25 = vpop.eup %1101 }
 0x2f4   :  { %v477_v11 = vadd.f32 %v1088_v19, %v476_v29 }
 0x2f6   :  { %v478_v63 = vadd.f32 %v1090_v50, %v477_v11 }
 0x2f8   :  { %v479_v20 = vadd.f32 %v1092_v1, %v478_v63 }
 0x2fa   :  { %v480_v55 = vadd.f32 %v1094_v0, %v479_v20 }
 0x2fc   :  { %v481_v33 = vadd.f32 %v1096_v32, %v480_v55 }
 0x2fe   :  { %v482_v35 = vadd.f32 %v1098_v21, %v481_v33 }
 0x300   :  { %v483_v48 = vadd.f32 %v1100_v37, %v482_v35 }
 0x302   :  { %v484_v38 = vadd.f32 %v1102_v25, %v483_v48 }
 0x304   :  { %v485_v26 = vrot.slane %v484_v38, 4 }
 0x306   :  { %v486_v27 = vadd.f32 %v485_v26, %v484_v38 }
 0x308   :  { %v487_v28 = vrot.slane %v486_v27, 2 }
 0x30a   :  { %v488_v10 = vadd.f32 %v487_v28, %v486_v27 }
 0x30c   :  { %v489_v18 = vrot.slane %v488_v10, 1 }
 0x30e   :  { %v490_v29 = vadd.f32 %v489_v18, %v488_v10 }
 0x310   :  { %1103 = vrcp.f32 %v490_v29  ;;  %v502_v34 = vand.u32 2147483648, %v490_v29  ;;  %v500_v40 = vand.u32 2147483647, %v490_v29  ;;  %vm496_vm3 = vweird.f32 %v490_v29 }
 0x312   :  { %v503_v55 = vor.u32 1.1754944e-38, %v502_v34  ;;  %vm501_vm5 = vcmp.eq.f32.partialorder %v500_v40, 8.507059e+37 }
 0x316   :  { %v1104_v15 = vpop.eup %1103 }
 0x317   :  { %v492_v22 = vmul.f32 %v1104_v15, %v490_v29  ;;  %vm497_vm2 = vweird.f32 %v1104_v15 }
 0x318   :  { %vm498_vm4 = vmor %vm496_vm3, %vm497_vm2 }
 0x319   :  { %v493_v11 = vsub.f32 1.0, %v492_v22 }
 0x31b   :  { %v494_v63 = vmul.f32 %v1104_v15, %v493_v11 }
 0x31d   :  { %v495_v20 = vadd.f32 %v1104_v15, %v494_v63 }
 0x31f   :  { %v499_v33 = vsel %vm498_vm4, %v1104_v15, %v495_v20 }
 0x320   :  { %v504_v35 = vsel %vm501_vm5, %v503_v55, %v499_v33 }
 0x321   :  { %v520_v48 = vmul.f32 %v1102_v25, %v504_v35  ;;  %v519_v38 = vmul.f32 %v1100_v37, %v504_v35  ;;  %v518_v26 = vmul.f32 %v1098_v21, %v504_v35  ;;  %v517_v27 = vmul.f32 %v1096_v32, %v504_v35 }
 0x322   :  { %v516_v28 = vmul.f32 %v1094_v0, %v504_v35  ;;  %v515_v10 = vmul.f32 %v1092_v1, %v504_v35  ;;  %v514_v18 = vmul.f32 %v1090_v50, %v504_v35  ;;  %v513_v31 = vmul.f32 %v1088_v19, %v504_v35 }
 0x323   :  { %521 = vmatpush.msra.mxu1 %v520_v48  ;;  %v512_v22 = vmul.f32 %v1086_v2, %v504_v35  ;;  %v511_v11 = vmul.f32 %v1620_v36, %v504_v35  ;;  %v510_v63 = vmul.f32 %v1615_v58, %v504_v35  ;;  %v509_v29 = vmul.f32 %v1610_v60, %v504_v35 }
 0x324   :  { %v508_v15 = vmul.f32 %v1606_v42, %v504_v35  ;;  %v507_v34 = vmul.f32 %v1601_v16, %v504_v35  ;;  %v506_v37 = vmul.f32 %v1595_v14, %v504_v35  ;;  %v505_v32 = vmul.f32 %v1593_v52, %v504_v35  ;;  %v58_v52 = vld [vmem:[%s1851_s4 + $0x1] sm:$0x3] }
 0x325   :  { %522 = vmatpush.msra.mxu1 %v519_v38  ;;  %v1868_v42 = vperm.slane %v1377_v54, 0  ;;  %v543_v60 = vperm.slane %v58_v52, 1  ;;  %v542_v36 = vperm.slane %v58_v52, 0 }
 0x327   :  { %523 = vmatpush.msra.mxu1 %v518_v26  ;;  %v115_v16 = vadd.f32 %v1466_v24, %v1868_v42  ;;  %546 = vrot.lane.b32.xlu1 %v543_v60, %s1209_s18 }
 0x328   :  { %544 = vrot.lane.b32.xlu2 %v542_v36, %s1209_s18 }
 0x329   :  { %524 = vmatpush.msra.mxu1 %v517_v27  ;;  %v143_v14 = vmax.f32 %v115_v16, 0.0 }
 0x32b   :  { %525 = vmatpush.msra.mxu1 %v516_v28 }
 0x32d   :  { %526 = vmatpush.msra.mxu1 %v515_v10  ;;  %v1869_v10 = vld [vmem:[#allocation14_spill] sm:$0xff] }
 0x32f   :  { %527 = vmatpush.msra.mxu1 %v514_v18 }
 0x331   :  { %528 = vmatpush.msra.mxu1 %v513_v31  ;;  %v652_v31 = vpop.permute.xlu2 %651 }
 0x333   :  { %529 = vmatpush.msra.mxu1 %v512_v22  ;;  %v1870_v22 = vld [vmem:[#allocation11_spill] sm:$0xff] }
 0x335   :  { %530 = vmatpush.msra.mxu1 %v511_v11 }
 0x337   :  { %531 = vmatpush.msra.mxu1 %v510_v63 }
 0x339   :  { %532 = vmatpush.msra.mxu1 %v509_v29  ;;  %v654_v54 = vpop.permute.xlu2 %653 }
 0x33b   :  { %533 = vmatpush.msra.mxu1 %v508_v15 }
 0x33d   :  { %534 = vmatpush.msra.mxu1 %v507_v34  ;;  %v1872_v34 = vld [vmem:[#allocation13_spill] sm:$0xff] }
 0x33f   :  { %535 = vmatpush.msra.mxu1 %v506_v37 }
 0x341   :  { %536 = vmatpush.msra.mxu1 %v505_v32 }
 0x342   :  { %537 = vmatmul.f32.vlgmr.msra.gmra.mxu1 %v143_v14  ;;  %v1874_v14 = vld [vmem:[#allocation9_spill] sm:$0xff] }
 0x3bf   :  { %v538_v58 = vpop.f32.mrf.mxu1 }
 0x3c0   :  { %567 = vmatmul.f32.vlgmr.msrb.gmra.mxu2 %v538_v58 }
 0x3c1   :  { %920 = vmatpush.msrb.mxu2 %v1310_v39  ;;  %v656_v39 = vpop.permute.xlu2 %655 }
 0x3c3   :  { %921 = vmatpush.msrb.mxu2 %v1319_v41 }
 0x3c5   :  { %922 = vmatpush.msrb.mxu2 %v1327_v43 }
 0x3c7   :  { %923 = vmatpush.msrb.mxu2 %v1336_v45  ;;  %v747_v45 = vpop.f32.mrf.mxu3 }
 0x3c8   :  { %1039 = vmatmul.msk.f32.vlgmr.msra.gmra.mxu2 %vm287_vm1, %v652_v31  ;;  %v748_v0 = vadd.f32 %v747_v45, %v1504_v3 }
 0x3c9   :  { %924 = vmatpush.msrb.mxu2 %v1345_v47  ;;  %v658_v41 = vpop.permute.xlu2 %657 }
 0x3cb   :  { %925 = vmatpush.msrb.mxu2 %v1354_v49 }
 0x3cd   :  { %926 = vmatpush.msrb.mxu2 %v1363_v51 }
 0x3cf   :  { %927 = vmatpush.msrb.mxu2 %v1372_v53  ;;  %v750_v47 = vpop.f32.mrf.mxu3 }
 0x3d0   :  { %1040 = vmatmul.msk.f32.gmra.mxu2 %vm287_vm1, %v654_v54  ;;  %v1675_v50 = vadd.f32 %v750_v47, %v1546_v44 }
 0x3d1   :  { %928 = vmatpush.msrb.mxu2 %v1386_v56  ;;  %v660_v43 = vpop.permute.xlu2 %659 }
 0x3d2   :  { %v781_v25 = vmax.f32 %v1675_v50, %v748_v0 }
 0x3d3   :  { %929 = vmatpush.msrb.mxu2 %v1396_v59 }
 0x3d5   :  { %930 = vmatpush.msrb.mxu2 %v1405_v61 }
 0x3d7   :  { %931 = vmatpush.msrb.mxu2 %v1423_v5  ;;  %v753_v49 = vpop.f32.mrf.mxu3  ;;  %v547_v5 = vpop.permute.xlu1 %546 }
 0x3d8   :  { %1041 = vmatmul.msk.f32.gmra.mxu2 %vm287_vm1, %v656_v39  ;;  %v1679_v21 = vadd.f32 %v753_v49, %v1548_v46 }
 0x3d9   :  { %932 = vmatpush.msrb.mxu2 %v1429_v6  ;;  %v545_v61 = vpop.permute.xlu2 %544 }
 0x3da   :  { %v1666_v6 = vsel %vm548_vm6, %v545_v61, %v547_v5  ;;  %v785_v20 = vmax.f32 %v781_v25, %v1679_v21 }
 0x3db   :  { %933 = vmatpush.msrb.mxu2 %v1434_v7 }
 0x3dd   :  { %934 = vmatpush.msrb.mxu2 %v1440_v8 }
 0x3df   :  { %935 = vmatpush.msrb.mxu2 %v1447_v9  ;;  %v756_v51 = vpop.f32.mrf.mxu3 }
 0x3e0   :  { %1042 = vmatmul.msk.f32.gmra.mxu2 %vm287_vm1, %v658_v41 }
 0x3e7   :  { %v759_v53 = vpop.f32.mrf.mxu3 }
 0x3e8   :  { %1043 = vmatmul.msk.f32.gmra.mxu2 %vm287_vm1, %v660_v43  ;;  %v1687_v55 = vadd.f32 %v759_v53, %v1512_v13 }
 0x3ef   :  { %v762_v56 = vpop.f32.mrf.mxu3 }
 0x3f0   :  { %v1691_v33 = vadd.f32 %v762_v56, %v1554_v57 }
 0x3f7   :  { %v765_v59 = vpop.f32.mrf.mxu3 }
 0x3f8   :  { %v1695_v35 = vadd.f32 %v765_v59, %v1556_v62 }
 0x3ff   :  { %v768_v7 = vpop.f32.mrf.mxu3 }
 0x400   :  { %v1699_v48 = vadd.f32 %v768_v7, %v1520_v17 }
 0x407   :  { %v771_v19 = vpop.f32.mrf.mxu3 }
 0x408   :  { %v1703_v13 = vadd.f32 %v771_v19, %v1530_v23  ;;  %v1871_v23 = vld [vmem:[#allocation12_spill] sm:$0xff] }
 0x40f   :  { %v774_v40 = vpop.f32.mrf.mxu3 }
 0x410   :  { %v1707_v27 = vadd.f32 %v774_v40, %v1560_v4  ;;  %v1873_v4 = vld [vmem:[#allocation10_spill] sm:$0xff] }
 0x417   :  { %v777_v26 = vpop.f32.mrf.mxu3 }
 0x418   :  { %v1711_v18 = vadd.f32 %v777_v26, %v1869_v10 }
 0x443   :  { %v568_v8 = vpop.f32.mrf.mxu2 }
 0x444   :  { %v569_v9 = vadd.f32 %v568_v8, %v1666_v6 }
 0x446   :  { %v1670_v24 = vadd.f32 %v569_v9, %v1293_v30  ;;  %v1683_v30 = vadd.f32 %v756_v51, %v1510_v12 }
 0x448   :  { %613 = vrot.lane.b32.xlu1 %v1670_v24, %s1210_s19  ;;  %v789_v44 = vmax.f32 %v785_v20, %v1683_v30  ;;  %v572_v36 = vsel %vm548_vm6, %v1670_v24, 0.0 }
 0x44a   :  { %v782_v46 = vmax.f32 %v1687_v55, %v789_v44 }
 0x44b   :  { %v732_v2 = vpop.f32.mrf.mxu2 }
 0x44c   :  { %v786_v12 = vmax.f32 %v782_v46, %v1691_v33  ;;  %v733_v42 = vadd.f32 %v732_v2, %v1873_v4 }
 0x44e   :  { %v790_v38 = vmax.f32 %v786_v12, %v1695_v35 }
 0x450   :  { %v783_v57 = vmax.f32 %v1699_v48, %v790_v38 }
 0x452   :  { %v787_v62 = vmax.f32 %v783_v57, %v1703_v13 }
 0x453   :  { %v735_v1 = vpop.f32.mrf.mxu2 }
 0x454   :  { %v791_v17 = vmax.f32 %v787_v62, %v1707_v27  ;;  %v736_v11 = vadd.f32 %v735_v1, %v1870_v22 }
 0x456   :  { %v793_v63 = vmax.f32 %v1711_v18, %v791_v17 }
 0x458   :  { %v784_v15 = vmax.f32 %v736_v11, %v793_v63 }
 0x45b   :  { %v738_v3 = vpop.f32.mrf.mxu2 }
 0x45c   :  { %v739_v29 = vadd.f32 %v738_v3, %v1871_v23 }
 0x45e   :  { %v788_v16 = vmax.f32 %v784_v15, %v739_v29 }
 0x463   :  { %v741_v28 = vpop.f32.mrf.mxu2 }
 0x464   :  { %v742_v37 = vadd.f32 %v741_v28, %v1872_v34 }
 0x466   :  { %v792_v60 = vmax.f32 %v788_v16, %v742_v37 }
 0x46b   :  { %v744_v32 = vpop.f32.mrf.mxu2 }
 0x46c   :  { %v745_v52 = vadd.f32 %v744_v32, %v1874_v14 }
 0x46e   :  { %v780_v31 = vmax.f32 %v733_v42, %v745_v52 }
 0x470   :  { %v794_v58 = vmax.f32 %v792_v60, %v780_v31 }
 0x472   :  { %v795_v54 = vrot.slane %v794_v58, 4  ;;  %573 = vadd.xlane.f32.xlu1 %v572_v36 }
 0x474   :  { %v796_v39 = vmax.f32 %v794_v58, %v795_v54 }
 0x476   :  { %v797_v41 = vrot.slane %v796_v39, 2 }
 0x478   :  { %v798_v43 = vmax.f32 %v796_v39, %v797_v41 }
 0x47a   :  { %v799_v45 = vrot.slane %v798_v43, 1 }
 0x47c   :  { %v1722_v47 = vmax.f32 %v798_v43, %v799_v45 }
 0x47e   :  { %v801_v49 = vsub.f32 %v733_v42, %v1722_v47  ;;  %v802_v51 = vsub.f32 %v736_v11, %v1722_v47  ;;  %v803_v53 = vsub.f32 %v739_v29, %v1722_v47  ;;  %v804_v56 = vsub.f32 %v742_v37, %v1722_v47 }
 0x47f   :  { %v805_v5 = vsub.f32 %v745_v52, %v1722_v47  ;;  %v806_v8 = vsub.f32 %v748_v0, %v1722_v47  ;;  %v807_v2 = vsub.f32 %v1675_v50, %v1722_v47  ;;  %v808_v1 = vsub.f32 %v1679_v21, %v1722_v47 }
 0x480   :  { %v817_v59 = vmul.f32 1.442695, %v801_v49  ;;  %v819_v61 = vmul.f32 1.442695, %v802_v51  ;;  %v821_v7 = vmul.f32 1.442695, %v803_v53  ;;  %v809_v44 = vsub.f32 %v1683_v30, %v1722_v47 }
 0x481   :  { %v823_v9 = vmul.f32 1.442695, %v804_v56  ;;  %v825_v19 = vmul.f32 1.442695, %v805_v5  ;;  %v827_v25 = vmul.f32 1.442695, %v806_v8  ;;  %v810_v46 = vsub.f32 %v1687_v55, %v1722_v47 }
 0x482   :  { %1105 = vpow2.f32 %v817_v59  ;;  %v829_v0 = vmul.f32 1.442695, %v807_v2  ;;  %v831_v21 = vmul.f32 1.442695, %v808_v1  ;;  %v811_v26 = vsub.f32 %v1691_v33, %v1722_v47 }
 0x483   :  { %1107 = vpow2.f32 %v819_v61  ;;  %v833_v30 = vmul.f32 1.442695, %v809_v44  ;;  %v812_v62 = vsub.f32 %v1695_v35, %v1722_v47  ;;  %v835_v55 = vmul.f32 1.442695, %v810_v46 }
 0x484   :  { %1109 = vpow2.f32 %v821_v7  ;;  %v813_v22 = vsub.f32 %v1699_v48, %v1722_v47  ;;  %v837_v33 = vmul.f32 1.442695, %v811_v26  ;;  %v814_v35 = vsub.f32 %v1703_v13, %v1722_v47 }
 0x485   :  { %1111 = vpow2.f32 %v823_v9  ;;  %v839_v23 = vmul.f32 1.442695, %v812_v62  ;;  %v815_v48 = vsub.f32 %v1707_v27, %v1722_v47  ;;  %v816_v4 = vsub.f32 %v1711_v18, %v1722_v47 }
 0x486   :  { %1113 = vpow2.f32 %v825_v19  ;;  %v841_v34 = vmul.f32 1.442695, %v813_v22  ;;  %v843_v42 = vmul.f32 1.442695, %v814_v35 }
 0x487   :  { %1115 = vpow2.f32 %v827_v25  ;;  %v845_v14 = vmul.f32 1.442695, %v815_v48  ;;  %v847_v31 = vmul.f32 1.442695, %v816_v4 }
 0x488   :  { %v1734_v40 = vpop.eup %1105  ;;  %1117 = vpow2.f32 %v829_v0 }
 0x489   :  { %v1736_v20 = vpop.eup %1107  ;;  %1119 = vpow2.f32 %v831_v21 }
 0x48a   :  { %v849_v3 = vadd.f32 %v1736_v20, %v1734_v40  ;;  %v1742_v50 = vpop.eup %1109  ;;  %1121 = vpow2.f32 %v833_v30 }
 0x48b   :  { %v1747_v38 = vpop.eup %1111  ;;  %1123 = vpow2.f32 %v835_v55 }
 0x48c   :  { %v850_v12 = vadd.f32 %v1742_v50, %v849_v3  ;;  %v1752_v28 = vpop.eup %1113  ;;  %1125 = vpow2.f32 %v837_v33 }
 0x48d   :  { %v1757_v17 = vpop.eup %1115  ;;  %1127 = vpow2.f32 %v839_v23 }
 0x48e   :  { %v851_v57 = vadd.f32 %v1747_v38, %v850_v12  ;;  %v1762_v63 = vpop.eup %1117  ;;  %1129 = vpow2.f32 %v841_v34 }
 0x48f   :  { %v1767_v15 = vpop.eup %1119  ;;  %1131 = vpow2.f32 %v843_v42 }
 0x490   :  { %v852_v10 = vadd.f32 %v1752_v28, %v851_v57  ;;  %v1772_v32 = vpop.eup %1121  ;;  %1133 = vpow2.f32 %v845_v14 }
 0x491   :  { %v1124_v16 = vpop.eup %1123  ;;  %1135 = vpow2.f32 %v847_v31 }
 0x492   :  { %v853_v11 = vadd.f32 %v1757_v17, %v852_v10  ;;  %v1126_v60 = vpop.eup %1125 }
 0x493   :  { %v1128_v27 = vpop.eup %1127 }
 0x494   :  { %v854_v29 = vadd.f32 %v1762_v63, %v853_v11  ;;  %v1130_v54 = vpop.eup %1129 }
 0x495   :  { %v1132_v41 = vpop.eup %1131 }
 0x496   :  { %v855_v37 = vadd.f32 %v1767_v15, %v854_v29  ;;  %v1134_v18 = vpop.eup %1133 }
 0x497   :  { %v1136_v47 = vpop.eup %1135 }
 0x498   :  { %v856_v13 = vadd.f32 %v1772_v32, %v855_v37  ;;  %v1875_v37 = vld [vmem:[#allocation8_spill] sm:$0xff] }
 0x49a   :  { %v857_v52 = vadd.f32 %v1124_v16, %v856_v13 }
 0x49c   :  { %v858_v58 = vadd.f32 %v1126_v60, %v857_v52 }
 0x49e   :  { %v859_v36 = vadd.f32 %v1128_v27, %v858_v58  ;;  %v1149_v58 = vld [vmem:[%s1847_s0 + $0x8] sm:$0xff] }
 0x4a0   :  { %v860_v39 = vadd.f32 %v1130_v54, %v859_v36 }
 0x4a2   :  { %v861_v43 = vadd.f32 %v1132_v41, %v860_v39 }
 0x4a4   :  { %v862_v45 = vadd.f32 %v1134_v18, %v861_v43 }
 0x4a6   :  { %v863_v49 = vadd.f32 %v1136_v47, %v862_v45 }
 0x4a8   :  { %v864_v51 = vrot.slane %v863_v49, 4 }
 0x4aa   :  { %v865_v53 = vadd.f32 %v864_v51, %v863_v49 }
 0x4ac   :  { %v866_v56 = vrot.slane %v865_v53, 2 }
 0x4ae   :  { %v867_v59 = vadd.f32 %v866_v56, %v865_v53  ;;  %v1069_v56 = vld [vmem:[%s1851_s4 + $0x2] ss:$0 sm:$0xff] }
 0x4b0   :  { %v868_v61 = vrot.slane %v867_v59, 1 }
 0x4b2   :  { %v869_v5 = vadd.f32 %v868_v61, %v867_v59  ;;  %v1070_v59 = vld [vmem:[%s1851_s4 + $0x3] ss:$0 sm:$0xff] }
 0x4b4   :  { %1137 = vrcp.f32 %v869_v5  ;;  %v881_v1 = vand.u32 2147483648, %v869_v5  ;;  %v879_v44 = vand.u32 2147483647, %v869_v5  ;;  %vm875_vm8 = vweird.f32 %v869_v5 }
 0x4b6   :  { %v882_v3 = vor.u32 1.1754944e-38, %v881_v1  ;;  %vm880_vm10 = vcmp.eq.f32.partialorder %v879_v44, 8.507059e+37 }
 0x4ba   :  { %v614_v7 = vpop.permute.xlu1 %613  ;;  %v1138_v8 = vpop.eup %1137 }
 0x4bb   :  { %v616_v9 = vsel %vm548_vm6, %v614_v7, 0.0  ;;  %v871_v2 = vmul.f32 %v1138_v8, %v869_v5  ;;  %vm876_vm7 = vweird.f32 %v1138_v8 }
 0x4bc   :  { %617 = vadd.xlane.f32.xlu1 %v616_v9  ;;  %vm877_vm9 = vmor %vm875_vm8, %vm876_vm7 }
 0x4bd   :  { %v872_v19 = vsub.f32 1.0, %v871_v2 }
 0x4bf   :  { %v873_v25 = vmul.f32 %v1138_v8, %v872_v19 }
 0x4c1   :  { %v874_v0 = vadd.f32 %v1138_v8, %v873_v25 }
 0x4c3   :  { %v878_v46 = vsel %vm877_vm9, %v1138_v8, %v874_v0  ;;  %vm649_vm9 = vcmask 523520  }
 0x4c4   :  { %v883_v21 = vsel %vm880_vm10, %v882_v3, %v878_v46  ;;  %vm1007_vm10 = vcmask 1048320  }
 0x4c5   :  { %v899_v12 = vmul.f32 %v1136_v47, %v883_v21  ;;  %v898_v26 = vmul.f32 %v1134_v18, %v883_v21  ;;  %v897_v30 = vmul.f32 %v1132_v41, %v883_v21  ;;  %v896_v57 = vmul.f32 %v1130_v54, %v883_v21 }
 0x4c6   :  { %v895_v62 = vmul.f32 %v1128_v27, %v883_v21  ;;  %v894_v55 = vmul.f32 %v1126_v60, %v883_v21  ;;  %v893_v10 = vmul.f32 %v1124_v16, %v883_v21  ;;  %v892_v22 = vmul.f32 %v1772_v32, %v883_v21 }
 0x4c7   :  { %900 = vmatpush.msrb.mxu1 %v899_v12  ;;  %v891_v33 = vmul.f32 %v1767_v15, %v883_v21  ;;  %v890_v11 = vmul.f32 %v1762_v63, %v883_v21  ;;  %v889_v23 = vmul.f32 %v1757_v17, %v883_v21  ;;  %v888_v35 = vmul.f32 %v1752_v28, %v883_v21 }
 0x4c8   :  { %v887_v29 = vmul.f32 %v1747_v38, %v883_v21  ;;  %v886_v34 = vmul.f32 %v1742_v50, %v883_v21  ;;  %v885_v48 = vmul.f32 %v1736_v20, %v883_v21  ;;  %v884_v15 = vmul.f32 %v1734_v40, %v883_v21 }
 0x4c9   :  { %901 = vmatpush.msrb.mxu1 %v898_v26  ;;  %v145_v63 = vmax.f32 %v1875_v37, 0.0  ;;  %v1211_v17 = vmov 32.0  }
 0x4ca   :  { %1139 = vrcp.f32 %v1211_v17 }
 0x4cb   :  { %902 = vmatpush.msrb.mxu1 %v897_v30 }
 0x4cd   :  { %903 = vmatpush.msrb.mxu1 %v896_v57 }
 0x4cf   :  { %904 = vmatpush.msrb.mxu1 %v895_v62 }
 0x4d0   :  { %v1140_v32 = vpop.eup %1139 }
 0x4d1   :  { %905 = vmatpush.msrb.mxu1 %v894_v55  ;;  %v576_v28 = vmul.f32 32.0, %v1140_v32  ;;  %vm580_vm11 = vweird.f32 %v1140_v32 }
 0x4d3   :  { %906 = vmatpush.msrb.mxu1 %v893_v10  ;;  %v577_v4 = vsub.f32 1.0, %v576_v28 }
 0x4d5   :  { %907 = vmatpush.msrb.mxu1 %v892_v22  ;;  %v578_v42 = vmul.f32 %v1140_v32, %v577_v4 }
 0x4d7   :  { %908 = vmatpush.msrb.mxu1 %v891_v33  ;;  %v579_v13 = vadd.f32 %v1140_v32, %v578_v42 }
 0x4d9   :  { %909 = vmatpush.msrb.mxu1 %v890_v11  ;;  %v1788_v50 = vsel %vm580_vm11, %v1140_v32, %v579_v13 }
 0x4db   :  { %910 = vmatpush.msrb.mxu1 %v889_v23 }
 0x4dd   :  { %911 = vmatpush.msrb.mxu1 %v888_v35 }
 0x4df   :  { %912 = vmatpush.msrb.mxu1 %v887_v29 }
 0x4e1   :  { %913 = vmatpush.msrb.mxu1 %v886_v34 }
 0x4e3   :  { %914 = vmatpush.msrb.mxu1 %v885_v48 }
 0x4e5   :  { %915 = vmatpush.msrb.mxu1 %v884_v15  ;;  %v574_v38 = vpop.xlane.xlu1 %573 }
 0x4e6   :  { %916 = vmatmul.f32.vlgmr.msrb.gmra.mxu1 %v145_v63  ;;  %v582_v7 = vmul.f32 %v1788_v50, %v574_v38 }
 0x4e8   :  { %v1819_v8 = vsub.f32 %v1670_v24, %v582_v7 }
 0x4ea   :  { %v584_v9 = vmul.f32 %v1819_v8, %v1819_v8 }
 0x4ec   :  { %v585_v2 = vsel %vm548_vm6, %v584_v9, 0.0 }
 0x52f   :  { %v618_v16 = vpop.xlane.xlu1 %617 }
 0x530   :  { %v619_v20 = vmul.f32 %v618_v16, %v1788_v50 }
 0x532   :  { %v1792_v40 = vsub.f32 %v1670_v24, %v619_v20 }
 0x534   :  { %v621_v14 = vmul.f32 %v1792_v40, %v1792_v40 }
 0x536   :  { %623 = vrot.lane.b32.xlu1 %v621_v14, %s1210_s19 }
 0x563   :  { %v917_v52 = vpop.f32.mrf.mxu1 }
 0x564   :  { %936 = vmatmul.f32.vlgmr.msrb.gmra.mxu2 %v917_v52 }
 0x5a8   :  { %v624_v19 = vpop.permute.xlu1 %623 }
 0x5a9   :  { %v626_v1 = vsel %vm548_vm6, %v624_v19, 0.0 }
 0x5e7   :  { %v937_v60 = vpop.f32.mrf.mxu2 }
 0x5e8   :  { %v938_v31 = vadd.f32 %v937_v60, %v1666_v6 }
 0x5ea   :  { %v940_v27 = vadd.f32 %v1149_v58, %v938_v31 }
 0x5ec   :  { %972 = vrot.lane.b32.xlu2 %v940_v27, %s1210_s19  ;;  %v941_v36 = vsel %vm548_vm6, %v940_v27, 0.0 }
 0x615   :  { %942 = vadd.xlane.f32.xlu2 %v941_v36 }
 0x646   :  { %v973_v54 = vpop.permute.xlu2 %972 }
 0x647   :  { %v975_v39 = vsel %vm548_vm6, %v973_v54, 0.0 }
 0x648   :  { %976 = vadd.xlane.f32.xlu2 %v975_v39 }
 0x688   :  { %v943_v41 = vpop.xlane.xlu2 %942 }
 0x689   :  { %v944_v47 = vmul.f32 %v943_v41, %v1788_v50 }
 0x68b   :  { %v945_v49 = vsub.f32 %v940_v27, %v944_v47 }
 0x68d   :  { %v946_v51 = vmul.f32 %v945_v49, %v945_v49 }
 0x68f   :  { %v947_v53 = vsel %vm548_vm6, %v946_v51, 0.0 }
 0x6bb   :  { %v977_v43 = vpop.xlane.xlu2 %976 }
 0x6bc   :  { %v978_v18 = vmul.f32 %v977_v43, %v1788_v50 }
 0x6be   :  { %v979_v45 = vsub.f32 %v940_v27, %v978_v18 }
 0x6c0   :  { %v980_v6 = vmul.f32 %v979_v45, %v979_v45 }
 0x6c2   :  { %982 = vrot.lane.b32.xlu2 %v980_v6, %s1210_s19 }
 0x6eb   :  { %948 = vadd.xlane.f32.xlu2 %v947_v53 }
 0x703   :  { %603 = vrot.lane.b32.xlu2 %v1069_v56, %s1210_s19 }
 0x70b   :  { %645 = vrot.lane.b32.xlu2 %v1070_v59, %s1209_s18 }
 0x71c   :  { %v983_v61 = vpop.permute.xlu2 %982 }
 0x71d   :  { %v985_v5 = vsel %vm548_vm6, %v983_v61, 0.0 }
 0x71e   :  { %986 = vadd.xlane.f32.xlu1 %v985_v5 }
 0x734   :  { %586 = vadd.xlane.f32.xlu2 %v585_v2 }
 0x737   :  { %607 = vrot.lane.b32.xlu1 %v1069_v56, %s1212_s25 }
 0x75e   :  { %v949_v25 = vpop.xlane.xlu2 %948 }
 0x75f   :  { %v950_v44 = vmul.f32 %v949_v25, %v1788_v50 }
 0x761   :  { %627 = vadd.xlane.f32.xlu1 %v626_v1  ;;  %v951_v0 = vadd.f32 1e-05, %v950_v44 }
 0x763   :  { %1141 = vrsqrt.f32 %v951_v0  ;;  %vm958_vm13 = vweird.f32 %v951_v0 }
 0x766   :  { %v604_v57 = vpop.permute.xlu2 %603 }
 0x769   :  { %v1142_v24 = vpop.eup %1141 }
 0x76a   :  { %v953_v3 = vmul.f32 %v1142_v24, %v951_v0  ;;  %vm959_vm12 = vweird.f32 %v1142_v24 }
 0x76b   :  { %vm960_vm14 = vmor %vm958_vm13, %vm959_vm12 }
 0x76c   :  { %v954_v46 = vmul.f32 %v1142_v24, %v953_v3 }
 0x76e   :  { %v955_v30 = vmul.f32 0.5, %v954_v46  ;;  %v646_v33 = vpop.permute.xlu2 %645 }
 0x770   :  { %v956_v62 = vsub.f32 1.5, %v955_v30 }
 0x772   :  { %v957_v10 = vmul.f32 %v1142_v24, %v956_v62 }
 0x774   :  { %v961_v23 = vsel %vm960_vm14, %v1142_v24, %v957_v10 }
 0x775   :  { %v962_v34 = vmul.f32 %v961_v23, %v945_v49 }
 0x777   :  { %v963_v63 = vmul.f32 %v962_v34, %v604_v57 }
 0x791   :  { %v987_v21 = vpop.xlane.xlu1 %986 }
 0x792   :  { %v988_v12 = vmul.f32 %v987_v21, %v1788_v50 }
 0x794   :  { %v989_v26 = vadd.f32 1e-05, %v988_v12 }
 0x796   :  { %1143 = vrsqrt.f32 %v989_v26  ;;  %vm996_vm0 = vweird.f32 %v989_v26 }
 0x79c   :  { %v1144_v55 = vpop.eup %1143 }
 0x79d   :  { %v991_v22 = vmul.f32 %v1144_v55, %v989_v26  ;;  %vm997_vm15 = vweird.f32 %v1144_v55 }
 0x79e   :  { %vm998_vm1 = vmor %vm996_vm0, %vm997_vm15 }
 0x79f   :  { %v992_v11 = vmul.f32 %v1144_v55, %v991_v22 }
 0x7a1   :  { %v993_v35 = vmul.f32 0.5, %v992_v11 }
 0x7a3   :  { %v994_v29 = vsub.f32 1.5, %v993_v35 }
 0x7a5   :  { %v995_v48 = vmul.f32 %v1144_v55, %v994_v29 }
 0x7a7   :  { %v587_v15 = vpop.xlane.xlu2 %586  ;;  %v999_v37 = vsel %vm998_vm1, %v1144_v55, %v995_v48 }
 0x7a8   :  { %v588_v17 = vmul.f32 %v587_v15, %v1788_v50  ;;  %v1000_v4 = vmul.f32 %v999_v37, %v979_v45 }
 0x7a9   :  { %v608_v32 = vpop.permute.xlu1 %607 }
 0x7aa   :  { %v589_v28 = vadd.f32 1e-05, %v588_v17  ;;  %v964_v42 = vadd.f32 %v963_v63, %v608_v32  ;;  %v1001_v38 = vmul.f32 %v1000_v4, %v608_v32 }
 0x7ac   :  { %1145 = vrsqrt.f32 %v589_v28  ;;  %966 = vrot.lane.b32.xlu0 %v964_v42, %s1212_s25  ;;  %v1002_v16 = vadd.f32 %v1001_v38, %v646_v33  ;;  %vm596_vm3 = vweird.f32 %v589_v28 }
 0x7b2   :  { %v1146_v13 = vpop.eup %1145 }
 0x7b3   :  { %v591_v20 = vmul.f32 %v1146_v13, %v589_v28  ;;  %vm597_vm2 = vweird.f32 %v1146_v13 }
 0x7b4   :  { %1004 = vrot.lane.b32.xlu0 %v1002_v16, %s1212_s25  ;;  %vm598_vm4 = vmor %vm596_vm3, %vm597_vm2 }
 0x7b5   :  { %v592_v14 = vmul.f32 %v1146_v13, %v591_v20 }
 0x7b7   :  { %v593_v52 = vmul.f32 0.5, %v592_v14 }
 0x7b9   :  { %v594_v60 = vsub.f32 1.5, %v593_v52 }
 0x7bb   :  { %v595_v31 = vmul.f32 %v1146_v13, %v594_v60 }
 0x7bd   :  { %v599_v58 = vsel %vm598_vm4, %v1146_v13, %v595_v31 }
 0x7be   :  { %v600_v27 = vmul.f32 %v599_v58, %v1819_v8 }
 0x7c0   :  { %v606_v36 = vmul.f32 %v604_v57, %v600_v27 }
 0x7c2   :  { %v610_v54 = vadd.f32 %v608_v32, %v606_v36 }
 0x7c4   :  { %611 = vst.msk [vmem:[%s1853_s6] sm:$0xff] %vm548_vm6, %v610_v54  ;;  %vm969_vm6 = vcmask 785920  }
 0x7d4   :  { %v628_v39 = vpop.xlane.xlu1 %627 }
 0x7d5   :  { %v629_v41 = vmul.f32 %v628_v39, %v1788_v50 }
 0x7d7   :  { %v630_v43 = vadd.f32 1e-05, %v629_v41 }
 0x7d9   :  { %1147 = vrsqrt.f32 %v630_v43  ;;  %vm637_vm7 = vweird.f32 %v630_v43 }
 0x7df   :  { %v1148_v18 = vpop.eup %1147 }
 0x7e0   :  { %v632_v45 = vmul.f32 %v1148_v18, %v630_v43  ;;  %vm638_vm5 = vweird.f32 %v1148_v18 }
 0x7e1   :  { %vm639_vm8 = vmor %vm637_vm7, %vm638_vm5 }
 0x7e2   :  { %v633_v6 = vmul.f32 %v1148_v18, %v632_v45 }
 0x7e4   :  { %v634_v47 = vmul.f32 0.5, %v633_v6 }
 0x7e6   :  { %v635_v49 = vsub.f32 1.5, %v634_v47 }
 0x7e8   :  { %v636_v51 = vmul.f32 %v1148_v18, %v635_v49 }
 0x7ea   :  { %v640_v53 = vsel %vm639_vm8, %v1148_v18, %v636_v51 }
 0x7eb   :  { %v641_v56 = vmul.f32 %v640_v53, %v1792_v40 }
 0x7ed   :  { %v642_v59 = vmul.f32 %v641_v56, %v608_v32 }
 0x7ef   :  { %v648_v61 = vadd.f32 %v646_v33, %v642_v59 }
 0x7f1   :  { %650 = vst.msk [vmem:[%s1853_s6] sm:$0xff] %vm649_vm9, %v648_v61 }
 0x81e   :  { %v967_v50 = vpop.permute.xlu0 %966 }
 0x81f   :  { %970 = vst.msk [vmem:[%s1853_s6] sm:$0xff] %vm969_vm6, %v967_v50 }
 0x826   :  { %v1005_v5 = vpop.permute.xlu0 %1004 }
 0x827   :  { %1008 = vst.msk [vmem:[%s1853_s6] sm:$0xff] %vm1007_vm10, %v1005_v5 }
 0x828   :  { %1013 = vsyncpa [#allocation3], 1 }
 0x829   :  { %1014 = vsyncpa [#allocation5], 1 }

</bundles_post_ra>
